<compile_context>
chip_gen: v5e
topology: v5e:2x2
jax: 0.10.0
libtpu: 0.0.40
codegen_flags: <defaults>
</compile_context>

<pallas_src>
import functools

import numpy as np
import jax
import jax.numpy as jnp
from jax import lax
from jax.experimental import pallas as pl
from jax.experimental.pallas import tpu as pltpu


def _round_up(x, m):
    return -(-x // m) * m


# ----------------------------- in-kernel helpers -----------------------------

def _mm_t(a, b):
    # a @ b.T, contracting the last dims, f32 accumulation on the MXU.
    return lax.dot_general(a, b, (((a.ndim - 1,), (b.ndim - 1,)), ((), ())),
                           preferred_element_type=jnp.float32)


def _mm(a, b):
    return jnp.dot(a, b, preferred_element_type=jnp.float32)


def _softmax_last(x):
    # EUP approx reciprocal + one Newton step: no VPU divide on the critical
    # path, full f32 accuracy.
    x = x - jnp.max(x, axis=-1, keepdims=True)
    e = jnp.exp(x)
    s = jnp.sum(e, axis=-1, keepdims=True)
    r = pl.reciprocal(s, approx=True)
    r = r * (2.0 - s * r)
    return e * r


# --------------------------------- kernel ------------------------------------

def _attention_gru_kernel(num_leaves, max_children, hp, level_sizes,
                          # ---- inputs -----------------------------------------
                          child_idx_ref,                       # SMEM [P*C] int32
                          bow_ref,                             # VMEM [N, Wp]
                          e_ref,                               # VMEM [Hp, Wp]
                          wall_ref, ball_ref,                  # VMEM [4Hp,Hp],[1,4Hp]
                          uzr_ref, uh_ref,                     # VMEM [2Hp,Hp],[Hp,Hp]
                          wout_ref, bout_ref,                  # VMEM [Nc,Hp],[1,Nc]
                          lvlmask_ref,                         # VMEM [L,maxP,maxP*C]
                          # ---- outputs ----------------------------------------
                          out_ref,                             # VMEM [1, Nc]
                          # ---- scratch ----------------------------------------
                          node_h_ref,                          # VMEM [N_pad, Hp]
                          child_buf_ref):                      # VMEM [maxPC_pad, Hp]
    C = max_children

    # ---- hoisted node-invariant precompute: one batched MXU pass -------------
    xe = _mm_t(bow_ref[...], e_ref[...])                  # [N, Hp]
    xe_all = _mm_t(xe, wall_ref[...]) + ball_ref[...]     # [N, 4Hp] = [Wz|Wr|Wh|attn]
    xe_zr = xe_all[:, :2 * hp]                            # xe@Wz.T+bz | xe@Wr.T+br
    xe_c = xe_all[:, 2 * hp:3 * hp]                       # xe@Wh.T+bh
    xe_attn = xe_all[:, 3 * hp:]                          # xe@W_attn

    # ---- leaf init: child_h == 0  =>  h = (1 - z) * tanh(xe@Wh.T + bh) -------
    z_leaf = jax.nn.sigmoid(xe_zr[:num_leaves, :hp])
    leaf_h = (1.0 - z_leaf) * jnp.tanh(xe_c[:num_leaves])      # [L, Hp]
    node_h_ref[pl.ds(0, num_leaves)] = leaf_h                  # one bulk block store

    # ---- level-batched bottom-up recurrence -----------------------------------
    # level_sizes is a static Python tuple -> unrolled; levels are few (tree depth).
    # TODO(synk): for very deep trees switch to lax.fori_loop over padded levels
    # guarded by pl.when to bound code size / register pressure.
    final_max = jnp.full((1, hp), -1e30, jnp.float32)
    off = num_leaves                                           # node row of first parent in level
    for lvl, p_l in enumerate(level_sizes):
        po = off - num_leaves                                  # offset into the parent tables
        pc = p_l * C

        # gather this level's child rows (static dest rows, dynamic source rows)
        for j in range(pc):
            child_buf_ref[pl.ds(j, 1)] = node_h_ref[pl.ds(child_idx_ref[po * C + j], 1)]
        child_rows = child_buf_ref[pl.ds(0, pc)]               # [pc, Hp]

        # attention: block-diagonal masked softmax(sigmoid(scores)) over each
        # parent's own child slots, then weighted child sum.  Both steps are
        # plain 2-D MXU matmuls; padded / foreign columns get weight exactly 0.
        pa = xe_attn[off:off + p_l]                            # [p_l, Hp]
        scores = jax.nn.sigmoid(_mm_t(pa, child_rows))         # [p_l, pc]
        attn = _softmax_last(scores + lvlmask_ref[lvl][:p_l, :pc])
        h_tilde = _mm(attn, child_rows)                        # [p_l, Hp]
        # NOTE: reference module calls self.norm(h_tilde) but discards it -> no-op.

        # fused z/r gates: one [p_l,Hp] x [Hp,2Hp] MXU push per level
        zr = jax.nn.sigmoid(xe_zr[off:off + p_l] + _mm_t(h_tilde, uzr_ref[...]))
        z = zr[:, :hp]
        r = zr[:, hp:]
        c = jnp.tanh(xe_c[off:off + p_l] + _mm_t(r * h_tilde, uh_ref[...]))
        # TODO(synk): nn.Dropout(0.1) on c is implemented as identity (inference mode).
        parent_h = z * h_tilde + (1.0 - z) * c                 # [p_l, Hp]

        node_h_ref[pl.ds(off, p_l)] = parent_h                 # one bulk block store
        final_max = jnp.maximum(final_max,
                                jnp.max(parent_h, axis=0, keepdims=True))
        off += p_l

    # ---- classifier: softmax(W_out.mul(final_state).sum(1) + b_out) ----------
    logits = _mm_t(final_max, wout_ref[...]) + bout_ref[...]   # [1, Nclass]
    out_ref[...] = _softmax_last(logits)


# --------------------------------- wrapper ------------------------------------

def attention_gru_forward(fused, bow, child_idx, lvl_mask, *,
                          num_leaves, level_sizes, max_children):
    num_nodes = bow.shape[0]
    hp = fused["U_h"].shape[0]
    wp = fused["E"].shape[1]
    nclass = fused["W_out"].shape[0]
    num_parents = sum(level_sizes)
    max_level = max(level_sizes)
    assert num_leaves >= 1 and num_parents >= 1
    assert num_nodes == num_leaves + num_parents
    assert child_idx.shape == (num_parents * max_children,)
    assert lvl_mask.shape == (len(level_sizes), max_level, max_level * max_children)
    assert bow.shape[1] <= wp

    bow_p = jnp.pad(bow.astype(jnp.float32), ((0, 0), (0, wp - bow.shape[1])))

    kernel = functools.partial(_attention_gru_kernel, num_leaves, max_children,
                               hp, tuple(level_sizes))
    inputs = (child_idx, bow_p, fused["E"], fused["W_all"], fused["b_all"],
              fused["U_zr"], fused["U_h"], fused["W_out"], fused["b_out"], lvl_mask)
    in_specs = ([pl.BlockSpec(memory_space=pltpu.MemorySpace.SMEM)]        # index table
                + [pl.BlockSpec(memory_space=pltpu.MemorySpace.VMEM)] * (len(inputs) - 1))

    # TODO(synk): for production, batch many trees per pallas_call (grid over trees,
    # dimension_semantics=("parallel",) so both v7x TensorCores are used) with
    # per-tree sizes as scalar-prefetch SMEM args and pl.when-guarded padded levels;
    # a single tiny tree cannot fill even one core.
    return pl.pallas_call(
        kernel,
        out_shape=jax.ShapeDtypeStruct((1, nclass), jnp.float32),
        in_specs=in_specs,
        out_specs=pl.BlockSpec(memory_space=pltpu.MemorySpace.VMEM),
        scratch_shapes=[
            pltpu.VMEM((_round_up(num_nodes, 8), hp), jnp.float32),              # node states
            pltpu.VMEM((_round_up(max_level * max_children, 8), hp), jnp.float32)  # child gather buffer
        ],
    )(*inputs)


# ------------------------------ params / glue ---------------------------------

def init_params(key, word_dim, hidden_dim, nclass):
    ks = jax.random.split(key, 9)
    nm = lambda k, shape: (0.1 * jax.random.normal(k, shape)).astype(jnp.float32)
    return dict(
        E_bu=nm(ks[0], (hidden_dim, word_dim)),
        W_z_bu=nm(ks[1], (hidden_dim, hidden_dim)),
        U_z_bu=nm(ks[2], (hidden_dim, hidden_dim)),
        b_z_bu=jnp.zeros((1, hidden_dim), jnp.float32),
        W_r_bu=nm(ks[3], (hidden_dim, hidden_dim)),
        U_r_bu=nm(ks[4], (hidden_dim, hidden_dim)),
        b_r_bu=jnp.zeros((1, hidden_dim), jnp.float32),
        W_h_bu=nm(ks[5], (hidden_dim, hidden_dim)),
        U_h_bu=nm(ks[6], (hidden_dim, hidden_dim)),
        b_h_bu=jnp.zeros((1, hidden_dim), jnp.float32),
        W_out_bu=nm(ks[7], (nclass, hidden_dim)),
        b_out_bu=jnp.zeros((1, nclass), jnp.float32),
        W_attn=nm(ks[8], (hidden_dim, hidden_dim)),
    )


def prepare_fused_params(params, lane=128):
    """One-time fusion + 128-lane zero padding of all weights (hoisted out of the
    per-call path).  Padded rows/cols are zero, which is inert for every gate."""
    H, W = params["E_bu"].shape
    nclass = params["W_out_bu"].shape[0]
    hp = _round_up(H, lane)
    wp = _round_up(W, lane)

    def pad(a, rows, cols):
        return jnp.pad(a.astype(jnp.float32),
                       ((0, rows - a.shape[0]), (0, cols - a.shape[1])))

    w_all = jnp.concatenate([pad(params["W_z_bu"], hp, hp),
                             pad(params["W_r_bu"], hp, hp),
                             pad(params["W_h_bu"], hp, hp),
                             pad(params["W_attn"].T, hp, hp)], axis=0)    # [4Hp, Hp]
    b_all = jnp.concatenate([pad(params["b_z_bu"], 1, hp),
                             pad(params["b_r_bu"], 1, hp),
                             pad(params["b_h_bu"], 1, hp),
                             jnp.zeros((1, hp), jnp.float32)], axis=1)     # [1, 4Hp]
    u_zr = jnp.concatenate([pad(params["U_z_bu"], hp, hp),
                            pad(params["U_r_bu"], hp, hp)], axis=0)        # [2Hp, Hp]
    return dict(E=pad(params["E_bu"], hp, wp),
                W_all=w_all, b_all=b_all, U_zr=u_zr,
                U_h=pad(params["U_h_bu"], hp, hp),
                W_out=pad(params["W_out_bu"], nclass, hp),
                b_out=params["b_out_bu"].astype(jnp.float32))


def build_tree_tensors(children, num_leaves, max_children):
    """Topologically level-sort parents.  Returns (node permutation new->old,
    per-level parent counts, flat SMEM child-index table in permuted node ids,
    per-level block-diagonal additive softmax masks)."""
    num_parents = len(children)
    num_nodes = num_leaves + num_parents
    depth = [0] * num_nodes
    for p, kids in enumerate(children):
        assert len(kids) >= 1, "every parent needs at least one real child"
        assert all(0 <= k < num_leaves + p for k in kids), "children must precede parent"
        depth[num_leaves + p] = 1 + max(depth[k] for k in kids)

    parent_order = sorted(range(num_parents), key=lambda p: depth[num_leaves + p])
    perm = list(range(num_leaves)) + [num_leaves + p for p in parent_order]
    old2new = {old: new for new, old in enumerate(perm)}

    level_sizes = []
    for p in parent_order:
        d = depth[num_leaves + p]
        while len(level_sizes) < d:
            level_sizes.append(0)
        level_sizes[d - 1] += 1
    level_sizes = tuple(level_sizes)
    max_level = max(level_sizes)

    # Padded child slots index node 0; they are gathered but their softmax weight
    # is exactly 0 (additive -1e9 mask underflows in f32) -> documented invariant.
    child_idx = np.zeros((num_parents * max_children,), np.int32)
    lvl_mask = np.full((len(level_sizes), max_level, max_level * max_children),
                       -1e9, np.float32)
    cursor = 0
    for lvl, p_l in enumerate(level_sizes):
        for p in range(p_l):
            old_p = parent_order[cursor + p]
            for j, k in enumerate(children[old_p]):
                child_idx[(cursor + p) * max_children + j] = old2new[k]
                lvl_mask[lvl, p, p * max_children + j] = 0.0
        cursor += p_l
    return perm, level_sizes, jnp.asarray(child_idx), jnp.asarray(lvl_mask)


def build_bag_of_words(x_word, x_index, word_dim):
    # Word2Vec(word, index) = sum_j word[j] * E_bu[:, index[j]]  -> dense bag-of-words
    onehot = jax.nn.one_hot(x_index, word_dim, dtype=jnp.float32)
    return jnp.sum(onehot * x_word[..., None], axis=1)


# ------------------------------ pure-JAX reference ----------------------------

def reference_forward(params, x_word, x_index, children, num_leaves, degree):
    E = params["E_bu"]
    H = E.shape[0]

    def w2v(w, idx):
        return (w[None, :] @ E[:, idx].T).astype(jnp.float32)     # [1, H]

    def gru(parent_xe, child_h):
        scores = jax.nn.sigmoid(parent_xe @ params["W_attn"] @ child_h.T)
        attn = jax.nn.softmax(scores, axis=-1)
        h_tilde = attn @ child_h
        z = jax.nn.sigmoid(parent_xe @ params["W_z_bu"].T + h_tilde @ params["U_z_bu"].T + params["b_z_bu"])
        r = jax.nn.sigmoid(parent_xe @ params["W_r_bu"].T + h_tilde @ params["U_r_bu"].T + params["b_r_bu"])
        c = jnp.tanh(parent_xe @ params["W_h_bu"].T + (r * h_tilde) @ params["U_h_bu"].T + params["b_h_bu"])
        return z * h_tilde + (1.0 - z) * c

    num_nodes = x_word.shape[0]
    xe = [w2v(x_word[i], x_index[i]) for i in range(num_nodes)]
    node_h = [gru(xe[i], jnp.zeros((degree, H), jnp.float32))[0] for i in range(num_leaves)]
    for p, kids in enumerate(children):
        child_h = jnp.stack([node_h[k] for k in kids], axis=0)
        node_h.append(gru(xe[num_leaves + p], child_h)[0])
    final = jnp.max(jnp.stack(node_h[num_leaves:], axis=0), axis=0)
    logits = (params["W_out_bu"] * final[None, :]).sum(axis=1) + params["b_out_bu"][0]
    return jax.nn.softmax(logits)[None, :]


# ----------------------------------- main --------------------------------------

if __name__ == "__main__":
    word_dim = 64          # vocabulary size
    hidden_dim = 32
    nclass = 4
    degree = 2
    words_per_node = 6

    num_leaves = 5
    # bottom-up tree: parents are nodes 5..8
    children = [[0, 1], [2, 3, 4], [5, 6], [7]]
    num_parents = len(children)
    num_nodes = num_leaves + num_parents
    max_children = 3

    key = jax.random.PRNGKey(0)
    kp, kw, ki = jax.random.split(key, 3)

    params = init_params(kp, word_dim, hidden_dim, nclass)
    x_word = jax.random.uniform(kw, (num_nodes, words_per_node), jnp.float32)
    x_index = jax.random.randint(ki, (num_nodes, words_per_node), 0, word_dim, jnp.int32)

    # one-time (per model) weight fusion + lane padding, and per-tree topology prep
    fused = prepare_fused_params(params)
    perm, level_sizes, child_idx, lvl_mask = build_tree_tensors(
        children, num_leaves, max_children)

    # permute node rows so parents are level-contiguous (identity for this tree)
    bow = build_bag_of_words(x_word, x_index, word_dim)[np.asarray(perm)]

    forward = jax.jit(functools.partial(attention_gru_forward,
                                        num_leaves=num_leaves,
                                        level_sizes=level_sizes,
                                        max_children=max_children))
    probs = jax.block_until_ready(forward(fused, bow, child_idx, lvl_mask))

    ref = jax.block_until_ready(
        reference_forward(params, x_word, x_index, children, num_leaves, degree))

    np.testing.assert_allclose(np.asarray(probs), np.asarray(ref), rtol=2e-4, atol=2e-4)
    assert np.isclose(float(np.asarray(probs).sum()), 1.0, atol=1e-5)
    print("KERNEL_OK")
</pallas_src>

<mosaic_0001>
module attributes {stable_mosaic.version = 11 : i64} {
  func.func @_attention_gru_kernel(%arg0: memref<12xi32, #tpu.memory_space<smem>>, %arg1: memref<9x128xf32, #tpu.memory_space<vmem>>, %arg2: memref<128x128xf32, #tpu.memory_space<vmem>>, %arg3: memref<512x128xf32, #tpu.memory_space<vmem>>, %arg4: memref<1x512xf32, #tpu.memory_space<vmem>>, %arg5: memref<256x128xf32, #tpu.memory_space<vmem>>, %arg6: memref<128x128xf32, #tpu.memory_space<vmem>>, %arg7: memref<4x128xf32, #tpu.memory_space<vmem>>, %arg8: memref<1x4xf32, #tpu.memory_space<vmem>>, %arg9: memref<3x2x6xf32, #tpu.memory_space<vmem>>, %arg10: memref<1x4xf32, #tpu.memory_space<vmem>>, %arg11: memref<16x128xf32, #tpu.memory_space<vmem>>, %arg12: memref<8x128xf32, #tpu.memory_space<vmem>>) attributes {dimension_semantics = [], scalar_prefetch = 0 : i64, scratch_operands = 2 : i64, tpu.core_type = #tpu.core_type<tc>} {
    %c0 = arith.constant 0 : index
    %c0_0 = arith.constant 0 : index
    %0 = vector.load %arg1[%c0, %c0_0] : memref<9x128xf32, #tpu.memory_space<vmem>>, vector<9x128xf32>
    %c0_1 = arith.constant 0 : index
    %c0_2 = arith.constant 0 : index
    %1 = vector.load %arg2[%c0_1, %c0_2] : memref<128x128xf32, #tpu.memory_space<vmem>>, vector<128x128xf32>
    %cst = arith.constant dense<0.000000e+00> : vector<9x128xf32>
    %2 = tpu.matmul %0, %1, %cst {dimension_numbers = #tpu.dot_dimension_numbers<[1], [1], [0], [0], [0, 0, 1, 0], [], []>} : vector<9x128xf32>, vector<128x128xf32>, vector<9x128xf32> -> vector<9x128xf32>
    %c0_3 = arith.constant 0 : index
    %c0_4 = arith.constant 0 : index
    %3 = vector.load %arg3[%c0_3, %c0_4] : memref<512x128xf32, #tpu.memory_space<vmem>>, vector<512x128xf32>
    %cst_5 = arith.constant dense<0.000000e+00> : vector<9x512xf32>
    %4 = tpu.matmul %2, %3, %cst_5 {dimension_numbers = #tpu.dot_dimension_numbers<[1], [1], [0], [0], [0, 0, 1, 0], [], []>} : vector<9x128xf32>, vector<512x128xf32>, vector<9x512xf32> -> vector<9x512xf32>
    %c0_6 = arith.constant 0 : index
    %c0_7 = arith.constant 0 : index
    %5 = vector.load %arg4[%c0_6, %c0_7] : memref<1x512xf32, #tpu.memory_space<vmem>>, vector<1x512xf32>
    %6 = vector.broadcast %5 : vector<1x512xf32> to vector<9x512xf32>
    %7 = arith.addf %4, %6 : vector<9x512xf32>
    %8 = vector.extract_strided_slice %7 {offsets = [0, 0], sizes = [9, 256], strides = [1, 1]} : vector<9x512xf32> to vector<9x256xf32>
    %9 = vector.extract_strided_slice %7 {offsets = [0, 256], sizes = [9, 128], strides = [1, 1]} : vector<9x512xf32> to vector<9x128xf32>
    %10 = vector.extract_strided_slice %7 {offsets = [0, 384], sizes = [9, 128], strides = [1, 1]} : vector<9x512xf32> to vector<9x128xf32>
    %11 = vector.extract_strided_slice %8 {offsets = [0, 0], sizes = [5, 128], strides = [1, 1]} : vector<9x256xf32> to vector<5x128xf32>
    %12 = arith.negf %11 : vector<5x128xf32>
    %13 = math.exp %12 : vector<5x128xf32>
    %cst_8 = arith.constant 1.000000e+00 : f32
    %14 = vector.broadcast %cst_8 : f32 to vector<5x128xf32>
    %15 = arith.addf %14, %13 : vector<5x128xf32>
    %16 = arith.divf %14, %15 : vector<5x128xf32>
    %cst_9 = arith.constant 1.000000e+00 : f32
    %17 = vector.broadcast %cst_9 : f32 to vector<5x128xf32>
    %18 = arith.subf %17, %16 : vector<5x128xf32>
    %19 = vector.extract_strided_slice %9 {offsets = [0, 0], sizes = [5, 128], strides = [1, 1]} : vector<9x128xf32> to vector<5x128xf32>
    %20 = math.tanh %19 : vector<5x128xf32>
    %21 = arith.mulf %18, %20 : vector<5x128xf32>
    %c0_10 = arith.constant 0 : index
    %c0_11 = arith.constant 0 : index
    %22 = vector.load %arg11[%c0_10, %c0_11] : memref<16x128xf32, #tpu.memory_space<vmem>>, vector<5x128xf32>
    tpu.vector_store %arg11[%c0_10, %c0_11], %21 {strides = array<i32>} : memref<16x128xf32, #tpu.memory_space<vmem>>, vector<5x128xf32>,
    %cst_12 = arith.constant -1.000000e+30 : f32
    %23 = vector.broadcast %cst_12 : f32 to vector<1x128xf32>
    %c0_13 = arith.constant 0 : index
    %24 = memref.load %arg0[%c0_13] : memref<12xi32, #tpu.memory_space<smem>>
    %25 = arith.index_cast %24 : i32 to index
    %c0_14 = arith.constant 0 : index
    %26 = vector.load %arg11[%25, %c0_14] : memref<16x128xf32, #tpu.memory_space<vmem>>, vector<1x128xf32>
    %c0_15 = arith.constant 0 : index
    %c0_16 = arith.constant 0 : index
    %27 = vector.load %arg12[%c0_15, %c0_16] : memref<8x128xf32, #tpu.memory_space<vmem>>, vector<1x128xf32>
    tpu.vector_store %arg12[%c0_15, %c0_16], %26 {strides = array<i32>} : memref<8x128xf32, #tpu.memory_space<vmem>>, vector<1x128xf32>,
    %c1 = arith.constant 1 : index
    %28 = memref.load %arg0[%c1] : memref<12xi32, #tpu.memory_space<smem>>
    %29 = arith.index_cast %28 : i32 to index
    %c0_17 = arith.constant 0 : index
    %30 = vector.load %arg11[%29, %c0_17] : memref<16x128xf32, #tpu.memory_space<vmem>>, vector<1x128xf32>
    %c1_18 = arith.constant 1 : index
    %c0_19 = arith.constant 0 : index
    %31 = vector.load %arg12[%c1_18, %c0_19] : memref<8x128xf32, #tpu.memory_space<vmem>>, vector<1x128xf32>
    tpu.vector_store %arg12[%c1_18, %c0_19], %30 {strides = array<i32>} : memref<8x128xf32, #tpu.memory_space<vmem>>, vector<1x128xf32>,
    %c2 = arith.constant 2 : index
    %32 = memref.load %arg0[%c2] : memref<12xi32, #tpu.memory_space<smem>>
    %33 = arith.index_cast %32 : i32 to index
    %c0_20 = arith.constant 0 : index
    %34 = vector.load %arg11[%33, %c0_20] : memref<16x128xf32, #tpu.memory_space<vmem>>, vector<1x128xf32>
    %c2_21 = arith.constant 2 : index
    %c0_22 = arith.constant 0 : index
    %35 = vector.load %arg12[%c2_21, %c0_22] : memref<8x128xf32, #tpu.memory_space<vmem>>, vector<1x128xf32>
    tpu.vector_store %arg12[%c2_21, %c0_22], %34 {strides = array<i32>} : memref<8x128xf32, #tpu.memory_space<vmem>>, vector<1x128xf32>,
    %c3 = arith.constant 3 : index
    %36 = memref.load %arg0[%c3] : memref<12xi32, #tpu.memory_space<smem>>
    %37 = arith.index_cast %36 : i32 to index
    %c0_23 = arith.constant 0 : index
    %38 = vector.load %arg11[%37, %c0_23] : memref<16x128xf32, #tpu.memory_space<vmem>>, vector<1x128xf32>
    %c3_24 = arith.constant 3 : index
    %c0_25 = arith.constant 0 : index
    %39 = vector.load %arg12[%c3_24, %c0_25] : memref<8x128xf32, #tpu.memory_space<vmem>>, vector<1x128xf32>
    tpu.vector_store %arg12[%c3_24, %c0_25], %38 {strides = array<i32>} : memref<8x128xf32, #tpu.memory_space<vmem>>, vector<1x128xf32>,
    %c4 = arith.constant 4 : index
    %40 = memref.load %arg0[%c4] : memref<12xi32, #tpu.memory_space<smem>>
    %41 = arith.index_cast %40 : i32 to index
    %c0_26 = arith.constant 0 : index
    %42 = vector.load %arg11[%41, %c0_26] : memref<16x128xf32, #tpu.memory_space<vmem>>, vector<1x128xf32>
    %c4_27 = arith.constant 4 : index
    %c0_28 = arith.constant 0 : index
    %43 = vector.load %arg12[%c4_27, %c0_28] : memref<8x128xf32, #tpu.memory_space<vmem>>, vector<1x128xf32>
    tpu.vector_store %arg12[%c4_27, %c0_28], %42 {strides = array<i32>} : memref<8x128xf32, #tpu.memory_space<vmem>>, vector<1x128xf32>,
    %c5 = arith.constant 5 : index
    %44 = memref.load %arg0[%c5] : memref<12xi32, #tpu.memory_space<smem>>
    %45 = arith.index_cast %44 : i32 to index
    %c0_29 = arith.constant 0 : index
    %46 = vector.load %arg11[%45, %c0_29] : memref<16x128xf32, #tpu.memory_space<vmem>>, vector<1x128xf32>
    %c5_30 = arith.constant 5 : index
    %c0_31 = arith.constant 0 : index
    %47 = vector.load %arg12[%c5_30, %c0_31] : memref<8x128xf32, #tpu.memory_space<vmem>>, vector<1x128xf32>
    tpu.vector_store %arg12[%c5_30, %c0_31], %46 {strides = array<i32>} : memref<8x128xf32, #tpu.memory_space<vmem>>, vector<1x128xf32>,
    %c0_32 = arith.constant 0 : index
    %c0_33 = arith.constant 0 : index
    %48 = vector.load %arg12[%c0_32, %c0_33] : memref<8x128xf32, #tpu.memory_space<vmem>>, vector<6x128xf32>
    %49 = vector.extract_strided_slice %10 {offsets = [5, 0], sizes = [2, 128], strides = [1, 1]} : vector<9x128xf32> to vector<2x128xf32>
    %cst_34 = arith.constant dense<0.000000e+00> : vector<2x6xf32>
    %50 = tpu.matmul %49, %48, %cst_34 {dimension_numbers = #tpu.dot_dimension_numbers<[1], [1], [0], [0], [0, 0, 1, 0], [], []>} : vector<2x128xf32>, vector<6x128xf32>, vector<2x6xf32> -> vector<2x6xf32>
    %51 = arith.negf %50 : vector<2x6xf32>
    %52 = math.exp %51 : vector<2x6xf32>
    %cst_35 = arith.constant 1.000000e+00 : f32
    %53 = vector.broadcast %cst_35 : f32 to vector<2x6xf32>
    %54 = arith.addf %53, %52 : vector<2x6xf32>
    %55 = arith.divf %53, %54 : vector<2x6xf32>
    %c0_36 = arith.constant 0 : index
    %c0_37 = arith.constant 0 : index
    %c0_38 = arith.constant 0 : index
    %56 = vector.load %arg9[%c0_36, %c0_37, %c0_38] : memref<3x2x6xf32, #tpu.memory_space<vmem>>, vector<1x2x6xf32>
    %57 = vector.shape_cast %56 : vector<1x2x6xf32> to vector<2x6xf32>
    %58 = arith.addf %55, %57 : vector<2x6xf32>
    %cst_39 = arith.constant dense<0xFF800000> : vector<2xf32>
    %59 = vector.multi_reduction <maximumf>, %58, %cst_39 [1] : vector<2x6xf32> to vector<2xf32>
    %60 = vector.shape_cast %59 : vector<2xf32> to vector<2x1xf32>
    %61 = vector.broadcast %60 : vector<2x1xf32> to vector<2x6xf32>
    %62 = arith.subf %58, %61 : vector<2x6xf32>
    %63 = math.exp %62 : vector<2x6xf32>
    %cst_40 = arith.constant dense<0.000000e+00> : vector<2xf32>
    %64 = vector.multi_reduction <add>, %63, %cst_40 [1] : vector<2x6xf32> to vector<2xf32>
    %65 = vector.shape_cast %64 : vector<2xf32> to vector<2x1xf32>
    %66 = tpu.reciprocal %65 {approx = true} : vector<2x1xf32> -> vector<2x1xf32>
    %67 = arith.mulf %65, %66 : vector<2x1xf32>
    %cst_41 = arith.constant 2.000000e+00 : f32
    %68 = vector.broadcast %cst_41 : f32 to vector<2x1xf32>
    %69 = arith.subf %68, %67 : vector<2x1xf32>
    %70 = arith.mulf %66, %69 : vector<2x1xf32>
    %71 = vector.broadcast %70 : vector<2x1xf32> to vector<2x6xf32>
    %72 = arith.mulf %63, %71 : vector<2x6xf32>
    %cst_42 = arith.constant dense<0.000000e+00> : vector<2x128xf32>
    %73 = tpu.matmul %72, %48, %cst_42 {dimension_numbers = #tpu.dot_dimension_numbers<[1], [0], [0], [1], [0, 0, 1, 1], [], []>} : vector<2x6xf32>, vector<6x128xf32>, vector<2x128xf32> -> vector<2x128xf32>
    %74 = vector.extract_strided_slice %8 {offsets = [5, 0], sizes = [2, 256], strides = [1, 1]} : vector<9x256xf32> to vector<2x256xf32>
    %c0_43 = arith.constant 0 : index
    %c0_44 = arith.constant 0 : index
    %75 = vector.load %arg5[%c0_43, %c0_44] : memref<256x128xf32, #tpu.memory_space<vmem>>, vector<256x128xf32>
    %cst_45 = arith.constant dense<0.000000e+00> : vector<2x256xf32>
    %76 = tpu.matmul %73, %75, %cst_45 {dimension_numbers = #tpu.dot_dimension_numbers<[1], [1], [0], [0], [0, 0, 1, 0], [], []>} : vector<2x128xf32>, vector<256x128xf32>, vector<2x256xf32> -> vector<2x256xf32>
    %77 = arith.addf %74, %76 : vector<2x256xf32>
    %78 = arith.negf %77 : vector<2x256xf32>
    %79 = math.exp %78 : vector<2x256xf32>
    %cst_46 = arith.constant 1.000000e+00 : f32
    %80 = vector.broadcast %cst_46 : f32 to vector<2x256xf32>
    %81 = arith.addf %80, %79 : vector<2x256xf32>
    %82 = arith.divf %80, %81 : vector<2x256xf32>
    %83 = vector.extract_strided_slice %82 {offsets = [0, 0], sizes = [2, 128], strides = [1, 1]} : vector<2x256xf32> to vector<2x128xf32>
    %84 = vector.extract_strided_slice %82 {offsets = [0, 128], sizes = [2, 128], strides = [1, 1]} : vector<2x256xf32> to vector<2x128xf32>
    %85 = vector.extract_strided_slice %9 {offsets = [5, 0], sizes = [2, 128], strides = [1, 1]} : vector<9x128xf32> to vector<2x128xf32>
    %86 = arith.mulf %84, %73 : vector<2x128xf32>
    %c0_47 = arith.constant 0 : index
    %c0_48 = arith.constant 0 : index
    %87 = vector.load %arg6[%c0_47, %c0_48] : memref<128x128xf32, #tpu.memory_space<vmem>>, vector<128x128xf32>
    %cst_49 = arith.constant dense<0.000000e+00> : vector<2x128xf32>
    %88 = tpu.matmul %86, %87, %cst_49 {dimension_numbers = #tpu.dot_dimension_numbers<[1], [1], [0], [0], [0, 0, 1, 0], [], []>} : vector<2x128xf32>, vector<128x128xf32>, vector<2x128xf32> -> vector<2x128xf32>
    %89 = arith.addf %85, %88 : vector<2x128xf32>
    %90 = math.tanh %89 : vector<2x128xf32>
    %91 = arith.mulf %83, %73 : vector<2x128xf32>
    %cst_50 = arith.constant 1.000000e+00 : f32
    %92 = vector.broadcast %cst_50 : f32 to vector<2x128xf32>
    %93 = arith.subf %92, %83 : vector<2x128xf32>
    %94 = arith.mulf %93, %90 : vector<2x128xf32>
    %95 = arith.addf %91, %94 : vector<2x128xf32>
    %c5_51 = arith.constant 5 : index
    %c0_52 = arith.constant 0 : index
    %96 = vector.load %arg11[%c5_51, %c0_52] : memref<16x128xf32, #tpu.memory_space<vmem>>, vector<2x128xf32>
    tpu.vector_store %arg11[%c5_51, %c0_52], %95 {strides = array<i32>} : memref<16x128xf32, #tpu.memory_space<vmem>>, vector<2x128xf32>,
    %cst_53 = arith.constant dense<0xFF800000> : vector<128xf32>
    %97 = vector.multi_reduction <maximumf>, %95, %cst_53 [0] : vector<2x128xf32> to vector<128xf32>
    %98 = vector.shape_cast %97 : vector<128xf32> to vector<1x128xf32>
    %99 = arith.maximumf %23, %98 : vector<1x128xf32>
    %c6 = arith.constant 6 : index
    %100 = memref.load %arg0[%c6] : memref<12xi32, #tpu.memory_space<smem>>
    %101 = arith.index_cast %100 : i32 to index
    %c0_54 = arith.constant 0 : index
    %102 = vector.load %arg11[%101, %c0_54] : memref<16x128xf32, #tpu.memory_space<vmem>>, vector<1x128xf32>
    %c0_55 = arith.constant 0 : index
    %c0_56 = arith.constant 0 : index
    %103 = vector.load %arg12[%c0_55, %c0_56] : memref<8x128xf32, #tpu.memory_space<vmem>>, vector<1x128xf32>
    tpu.vector_store %arg12[%c0_55, %c0_56], %102 {strides = array<i32>} : memref<8x128xf32, #tpu.memory_space<vmem>>, vector<1x128xf32>,
    %c7 = arith.constant 7 : index
    %104 = memref.load %arg0[%c7] : memref<12xi32, #tpu.memory_space<smem>>
    %105 = arith.index_cast %104 : i32 to index
    %c0_57 = arith.constant 0 : index
    %106 = vector.load %arg11[%105, %c0_57] : memref<16x128xf32, #tpu.memory_space<vmem>>, vector<1x128xf32>
    %c1_58 = arith.constant 1 : index
    %c0_59 = arith.constant 0 : index
    %107 = vector.load %arg12[%c1_58, %c0_59] : memref<8x128xf32, #tpu.memory_space<vmem>>, vector<1x128xf32>
    tpu.vector_store %arg12[%c1_58, %c0_59], %106 {strides = array<i32>} : memref<8x128xf32, #tpu.memory_space<vmem>>, vector<1x128xf32>,
    %c8 = arith.constant 8 : index
    %108 = memref.load %arg0[%c8] : memref<12xi32, #tpu.memory_space<smem>>
    %109 = arith.index_cast %108 : i32 to index
    %c0_60 = arith.constant 0 : index
    %110 = vector.load %arg11[%109, %c0_60] : memref<16x128xf32, #tpu.memory_space<vmem>>, vector<1x128xf32>
    %c2_61 = arith.constant 2 : index
    %c0_62 = arith.constant 0 : index
    %111 = vector.load %arg12[%c2_61, %c0_62] : memref<8x128xf32, #tpu.memory_space<vmem>>, vector<1x128xf32>
    tpu.vector_store %arg12[%c2_61, %c0_62], %110 {strides = array<i32>} : memref<8x128xf32, #tpu.memory_space<vmem>>, vector<1x128xf32>,
    %c0_63 = arith.constant 0 : index
    %c0_64 = arith.constant 0 : index
    %112 = vector.load %arg12[%c0_63, %c0_64] : memref<8x128xf32, #tpu.memory_space<vmem>>, vector<3x128xf32>
    %113 = vector.extract_strided_slice %10 {offsets = [7, 0], sizes = [1, 128], strides = [1, 1]} : vector<9x128xf32> to vector<1x128xf32>
    %cst_65 = arith.constant dense<0.000000e+00> : vector<1x3xf32>
    %114 = tpu.matmul %113, %112, %cst_65 {dimension_numbers = #tpu.dot_dimension_numbers<[1], [1], [0], [0], [0, 0, 1, 0], [], []>} : vector<1x128xf32>, vector<3x128xf32>, vector<1x3xf32> -> vector<1x3xf32>
    %115 = arith.negf %114 : vector<1x3xf32>
    %116 = math.exp %115 : vector<1x3xf32>
    %cst_66 = arith.constant 1.000000e+00 : f32
    %117 = vector.broadcast %cst_66 : f32 to vector<1x3xf32>
    %118 = arith.addf %117, %116 : vector<1x3xf32>
    %119 = arith.divf %117, %118 : vector<1x3xf32>
    %c1_67 = arith.constant 1 : index
    %c0_68 = arith.constant 0 : index
    %c0_69 = arith.constant 0 : index
    %120 = vector.load %arg9[%c1_67, %c0_68, %c0_69] : memref<3x2x6xf32, #tpu.memory_space<vmem>>, vector<1x2x6xf32>
    %121 = vector.shape_cast %120 : vector<1x2x6xf32> to vector<2x6xf32>
    %122 = vector.extract_strided_slice %121 {offsets = [0, 0], sizes = [1, 3], strides = [1, 1]} : vector<2x6xf32> to vector<1x3xf32>
    %123 = arith.addf %119, %122 : vector<1x3xf32>
    %cst_70 = arith.constant dense<0xFF800000> : vector<1xf32>
    %124 = vector.multi_reduction <maximumf>, %123, %cst_70 [1] : vector<1x3xf32> to vector<1xf32>
    %125 = vector.shape_cast %124 : vector<1xf32> to vector<1x1xf32>
    %126 = vector.broadcast %125 : vector<1x1xf32> to vector<1x3xf32>
    %127 = arith.subf %123, %126 : vector<1x3xf32>
    %128 = math.exp %127 : vector<1x3xf32>
    %cst_71 = arith.constant dense<0.000000e+00> : vector<1xf32>
    %129 = vector.multi_reduction <add>, %128, %cst_71 [1] : vector<1x3xf32> to vector<1xf32>
    %130 = vector.shape_cast %129 : vector<1xf32> to vector<1x1xf32>
    %131 = tpu.reciprocal %130 {approx = true} : vector<1x1xf32> -> vector<1x1xf32>
    %132 = arith.mulf %130, %131 : vector<1x1xf32>
    %cst_72 = arith.constant 2.000000e+00 : f32
    %133 = vector.broadcast %cst_72 : f32 to vector<1x1xf32>
    %134 = arith.subf %133, %132 : vector<1x1xf32>
    %135 = arith.mulf %131, %134 : vector<1x1xf32>
    %136 = vector.broadcast %135 : vector<1x1xf32> to vector<1x3xf32>
    %137 = arith.mulf %128, %136 : vector<1x3xf32>
    %cst_73 = arith.constant dense<0.000000e+00> : vector<1x128xf32>
    %138 = tpu.matmul %137, %112, %cst_73 {dimension_numbers = #tpu.dot_dimension_numbers<[1], [0], [0], [1], [0, 0, 1, 1], [], []>} : vector<1x3xf32>, vector<3x128xf32>, vector<1x128xf32> -> vector<1x128xf32>
    %139 = vector.extract_strided_slice %8 {offsets = [7, 0], sizes = [1, 256], strides = [1, 1]} : vector<9x256xf32> to vector<1x256xf32>
    %c0_74 = arith.constant 0 : index
    %c0_75 = arith.constant 0 : index
    %140 = vector.load %arg5[%c0_74, %c0_75] : memref<256x128xf32, #tpu.memory_space<vmem>>, vector<256x128xf32>
    %cst_76 = arith.constant dense<0.000000e+00> : vector<1x256xf32>
    %141 = tpu.matmul %138, %140, %cst_76 {dimension_numbers = #tpu.dot_dimension_numbers<[1], [1], [0], [0], [0, 0, 1, 0], [], []>} : vector<1x128xf32>, vector<256x128xf32>, vector<1x256xf32> -> vector<1x256xf32>
    %142 = arith.addf %139, %141 : vector<1x256xf32>
    %143 = arith.negf %142 : vector<1x256xf32>
    %144 = math.exp %143 : vector<1x256xf32>
    %cst_77 = arith.constant 1.000000e+00 : f32
    %145 = vector.broadcast %cst_77 : f32 to vector<1x256xf32>
    %146 = arith.addf %145, %144 : vector<1x256xf32>
    %147 = arith.divf %145, %146 : vector<1x256xf32>
    %148 = vector.extract_strided_slice %147 {offsets = [0, 0], sizes = [1, 128], strides = [1, 1]} : vector<1x256xf32> to vector<1x128xf32>
    %149 = vector.extract_strided_slice %147 {offsets = [0, 128], sizes = [1, 128], strides = [1, 1]} : vector<1x256xf32> to vector<1x128xf32>
    %150 = vector.extract_strided_slice %9 {offsets = [7, 0], sizes = [1, 128], strides = [1, 1]} : vector<9x128xf32> to vector<1x128xf32>
    %151 = arith.mulf %149, %138 : vector<1x128xf32>
    %c0_78 = arith.constant 0 : index
    %c0_79 = arith.constant 0 : index
    %152 = vector.load %arg6[%c0_78, %c0_79] : memref<128x128xf32, #tpu.memory_space<vmem>>, vector<128x128xf32>
    %cst_80 = arith.constant dense<0.000000e+00> : vector<1x128xf32>
    %153 = tpu.matmul %151, %152, %cst_80 {dimension_numbers = #tpu.dot_dimension_numbers<[1], [1], [0], [0], [0, 0, 1, 0], [], []>} : vector<1x128xf32>, vector<128x128xf32>, vector<1x128xf32> -> vector<1x128xf32>
    %154 = arith.addf %150, %153 : vector<1x128xf32>
    %155 = math.tanh %154 : vector<1x128xf32>
    %156 = arith.mulf %148, %138 : vector<1x128xf32>
    %cst_81 = arith.constant 1.000000e+00 : f32
    %157 = vector.broadcast %cst_81 : f32 to vector<1x128xf32>
    %158 = arith.subf %157, %148 : vector<1x128xf32>
    %159 = arith.mulf %158, %155 : vector<1x128xf32>
    %160 = arith.addf %156, %159 : vector<1x128xf32>
    %c7_82 = arith.constant 7 : index
    %c0_83 = arith.constant 0 : index
    %161 = vector.load %arg11[%c7_82, %c0_83] : memref<16x128xf32, #tpu.memory_space<vmem>>, vector<1x128xf32>
    tpu.vector_store %arg11[%c7_82, %c0_83], %160 {strides = array<i32>} : memref<16x128xf32, #tpu.memory_space<vmem>>, vector<1x128xf32>,
    %cst_84 = arith.constant dense<0xFF800000> : vector<128xf32>
    %162 = vector.multi_reduction <maximumf>, %160, %cst_84 [0] : vector<1x128xf32> to vector<128xf32>
    %163 = vector.shape_cast %162 : vector<128xf32> to vector<1x128xf32>
    %164 = arith.maximumf %99, %163 : vector<1x128xf32>
    %c9 = arith.constant 9 : index
    %165 = memref.load %arg0[%c9] : memref<12xi32, #tpu.memory_space<smem>>
    %166 = arith.index_cast %165 : i32 to index
    %c0_85 = arith.constant 0 : index
    %167 = vector.load %arg11[%166, %c0_85] : memref<16x128xf32, #tpu.memory_space<vmem>>, vector<1x128xf32>
    %c0_86 = arith.constant 0 : index
    %c0_87 = arith.constant 0 : index
    %168 = vector.load %arg12[%c0_86, %c0_87] : memref<8x128xf32, #tpu.memory_space<vmem>>, vector<1x128xf32>
    tpu.vector_store %arg12[%c0_86, %c0_87], %167 {strides = array<i32>} : memref<8x128xf32, #tpu.memory_space<vmem>>, vector<1x128xf32>,
    %c10 = arith.constant 10 : index
    %169 = memref.load %arg0[%c10] : memref<12xi32, #tpu.memory_space<smem>>
    %170 = arith.index_cast %169 : i32 to index
    %c0_88 = arith.constant 0 : index
    %171 = vector.load %arg11[%170, %c0_88] : memref<16x128xf32, #tpu.memory_space<vmem>>, vector<1x128xf32>
    %c1_89 = arith.constant 1 : index
    %c0_90 = arith.constant 0 : index
    %172 = vector.load %arg12[%c1_89, %c0_90] : memref<8x128xf32, #tpu.memory_space<vmem>>, vector<1x128xf32>
    tpu.vector_store %arg12[%c1_89, %c0_90], %171 {strides = array<i32>} : memref<8x128xf32, #tpu.memory_space<vmem>>, vector<1x128xf32>,
    %c11 = arith.constant 11 : index
    %173 = memref.load %arg0[%c11] : memref<12xi32, #tpu.memory_space<smem>>
    %174 = arith.index_cast %173 : i32 to index
    %c0_91 = arith.constant 0 : index
    %175 = vector.load %arg11[%174, %c0_91] : memref<16x128xf32, #tpu.memory_space<vmem>>, vector<1x128xf32>
    %c2_92 = arith.constant 2 : index
    %c0_93 = arith.constant 0 : index
    %176 = vector.load %arg12[%c2_92, %c0_93] : memref<8x128xf32, #tpu.memory_space<vmem>>, vector<1x128xf32>
    tpu.vector_store %arg12[%c2_92, %c0_93], %175 {strides = array<i32>} : memref<8x128xf32, #tpu.memory_space<vmem>>, vector<1x128xf32>,
    %c0_94 = arith.constant 0 : index
    %c0_95 = arith.constant 0 : index
    %177 = vector.load %arg12[%c0_94, %c0_95] : memref<8x128xf32, #tpu.memory_space<vmem>>, vector<3x128xf32>
    %178 = vector.extract_strided_slice %10 {offsets = [8, 0], sizes = [1, 128], strides = [1, 1]} : vector<9x128xf32> to vector<1x128xf32>
    %cst_96 = arith.constant dense<0.000000e+00> : vector<1x3xf32>
    %179 = tpu.matmul %178, %177, %cst_96 {dimension_numbers = #tpu.dot_dimension_numbers<[1], [1], [0], [0], [0, 0, 1, 0], [], []>} : vector<1x128xf32>, vector<3x128xf32>, vector<1x3xf32> -> vector<1x3xf32>
    %180 = arith.negf %179 : vector<1x3xf32>
    %181 = math.exp %180 : vector<1x3xf32>
    %cst_97 = arith.constant 1.000000e+00 : f32
    %182 = vector.broadcast %cst_97 : f32 to vector<1x3xf32>
    %183 = arith.addf %182, %181 : vector<1x3xf32>
    %184 = arith.divf %182, %183 : vector<1x3xf32>
    %c2_98 = arith.constant 2 : index
    %c0_99 = arith.constant 0 : index
    %c0_100 = arith.constant 0 : index
    %185 = vector.load %arg9[%c2_98, %c0_99, %c0_100] : memref<3x2x6xf32, #tpu.memory_space<vmem>>, vector<1x2x6xf32>
    %186 = vector.shape_cast %185 : vector<1x2x6xf32> to vector<2x6xf32>
    %187 = vector.extract_strided_slice %186 {offsets = [0, 0], sizes = [1, 3], strides = [1, 1]} : vector<2x6xf32> to vector<1x3xf32>
    %188 = arith.addf %184, %187 : vector<1x3xf32>
    %cst_101 = arith.constant dense<0xFF800000> : vector<1xf32>
    %189 = vector.multi_reduction <maximumf>, %188, %cst_101 [1] : vector<1x3xf32> to vector<1xf32>
    %190 = vector.shape_cast %189 : vector<1xf32> to vector<1x1xf32>
    %191 = vector.broadcast %190 : vector<1x1xf32> to vector<1x3xf32>
    %192 = arith.subf %188, %191 : vector<1x3xf32>
    %193 = math.exp %192 : vector<1x3xf32>
    %cst_102 = arith.constant dense<0.000000e+00> : vector<1xf32>
    %194 = vector.multi_reduction <add>, %193, %cst_102 [1] : vector<1x3xf32> to vector<1xf32>
    %195 = vector.shape_cast %194 : vector<1xf32> to vector<1x1xf32>
    %196 = tpu.reciprocal %195 {approx = true} : vector<1x1xf32> -> vector<1x1xf32>
    %197 = arith.mulf %195, %196 : vector<1x1xf32>
    %cst_103 = arith.constant 2.000000e+00 : f32
    %198 = vector.broadcast %cst_103 : f32 to vector<1x1xf32>
    %199 = arith.subf %198, %197 : vector<1x1xf32>
    %200 = arith.mulf %196, %199 : vector<1x1xf32>
    %201 = vector.broadcast %200 : vector<1x1xf32> to vector<1x3xf32>
    %202 = arith.mulf %193, %201 : vector<1x3xf32>
    %cst_104 = arith.constant dense<0.000000e+00> : vector<1x128xf32>
    %203 = tpu.matmul %202, %177, %cst_104 {dimension_numbers = #tpu.dot_dimension_numbers<[1], [0], [0], [1], [0, 0, 1, 1], [], []>} : vector<1x3xf32>, vector<3x128xf32>, vector<1x128xf32> -> vector<1x128xf32>
    %204 = vector.extract_strided_slice %8 {offsets = [8, 0], sizes = [1, 256], strides = [1, 1]} : vector<9x256xf32> to vector<1x256xf32>
    %c0_105 = arith.constant 0 : index
    %c0_106 = arith.constant 0 : index
    %205 = vector.load %arg5[%c0_105, %c0_106] : memref<256x128xf32, #tpu.memory_space<vmem>>, vector<256x128xf32>
    %cst_107 = arith.constant dense<0.000000e+00> : vector<1x256xf32>
    %206 = tpu.matmul %203, %205, %cst_107 {dimension_numbers = #tpu.dot_dimension_numbers<[1], [1], [0], [0], [0, 0, 1, 0], [], []>} : vector<1x128xf32>, vector<256x128xf32>, vector<1x256xf32> -> vector<1x256xf32>
    %207 = arith.addf %204, %206 : vector<1x256xf32>
    %208 = arith.negf %207 : vector<1x256xf32>
    %209 = math.exp %208 : vector<1x256xf32>
    %cst_108 = arith.constant 1.000000e+00 : f32
    %210 = vector.broadcast %cst_108 : f32 to vector<1x256xf32>
    %211 = arith.addf %210, %209 : vector<1x256xf32>
    %212 = arith.divf %210, %211 : vector<1x256xf32>
    %213 = vector.extract_strided_slice %212 {offsets = [0, 0], sizes = [1, 128], strides = [1, 1]} : vector<1x256xf32> to vector<1x128xf32>
    %214 = vector.extract_strided_slice %212 {offsets = [0, 128], sizes = [1, 128], strides = [1, 1]} : vector<1x256xf32> to vector<1x128xf32>
    %215 = vector.extract_strided_slice %9 {offsets = [8, 0], sizes = [1, 128], strides = [1, 1]} : vector<9x128xf32> to vector<1x128xf32>
    %216 = arith.mulf %214, %203 : vector<1x128xf32>
    %c0_109 = arith.constant 0 : index
    %c0_110 = arith.constant 0 : index
    %217 = vector.load %arg6[%c0_109, %c0_110] : memref<128x128xf32, #tpu.memory_space<vmem>>, vector<128x128xf32>
    %cst_111 = arith.constant dense<0.000000e+00> : vector<1x128xf32>
    %218 = tpu.matmul %216, %217, %cst_111 {dimension_numbers = #tpu.dot_dimension_numbers<[1], [1], [0], [0], [0, 0, 1, 0], [], []>} : vector<1x128xf32>, vector<128x128xf32>, vector<1x128xf32> -> vector<1x128xf32>
    %219 = arith.addf %215, %218 : vector<1x128xf32>
    %220 = math.tanh %219 : vector<1x128xf32>
    %221 = arith.mulf %213, %203 : vector<1x128xf32>
    %cst_112 = arith.constant 1.000000e+00 : f32
    %222 = vector.broadcast %cst_112 : f32 to vector<1x128xf32>
    %223 = arith.subf %222, %213 : vector<1x128xf32>
    %224 = arith.mulf %223, %220 : vector<1x128xf32>
    %225 = arith.addf %221, %224 : vector<1x128xf32>
    %c8_113 = arith.constant 8 : index
    %c0_114 = arith.constant 0 : index
    %226 = vector.load %arg11[%c8_113, %c0_114] : memref<16x128xf32, #tpu.memory_space<vmem>>, vector<1x128xf32>
    tpu.vector_store %arg11[%c8_113, %c0_114], %225 {strides = array<i32>} : memref<16x128xf32, #tpu.memory_space<vmem>>, vector<1x128xf32>,
    %cst_115 = arith.constant dense<0xFF800000> : vector<128xf32>
    %227 = vector.multi_reduction <maximumf>, %225, %cst_115 [0] : vector<1x128xf32> to vector<128xf32>
    %228 = vector.shape_cast %227 : vector<128xf32> to vector<1x128xf32>
    %229 = arith.maximumf %164, %228 : vector<1x128xf32>
    %c0_116 = arith.constant 0 : index
    %c0_117 = arith.constant 0 : index
    %230 = vector.load %arg7[%c0_116, %c0_117] : memref<4x128xf32, #tpu.memory_space<vmem>>, vector<4x128xf32>
    %cst_118 = arith.constant dense<0.000000e+00> : vector<1x4xf32>
    %231 = tpu.matmul %229, %230, %cst_118 {dimension_numbers = #tpu.dot_dimension_numbers<[1], [1], [0], [0], [0, 0, 1, 0], [], []>} : vector<1x128xf32>, vector<4x128xf32>, vector<1x4xf32> -> vector<1x4xf32>
    %c0_119 = arith.constant 0 : index
    %c0_120 = arith.constant 0 : index
    %232 = vector.load %arg8[%c0_119, %c0_120] : memref<1x4xf32, #tpu.memory_space<vmem>>, vector<1x4xf32>
    %233 = arith.addf %231, %232 : vector<1x4xf32>
    %cst_121 = arith.constant dense<0xFF800000> : vector<1xf32>
    %234 = vector.multi_reduction <maximumf>, %233, %cst_121 [1] : vector<1x4xf32> to vector<1xf32>
    %235 = vector.shape_cast %234 : vector<1xf32> to vector<1x1xf32>
    %236 = vector.broadcast %235 : vector<1x1xf32> to vector<1x4xf32>
    %237 = arith.subf %233, %236 : vector<1x4xf32>
    %238 = math.exp %237 : vector<1x4xf32>
    %cst_122 = arith.constant dense<0.000000e+00> : vector<1xf32>
    %239 = vector.multi_reduction <add>, %238, %cst_122 [1] : vector<1x4xf32> to vector<1xf32>
    %240 = vector.shape_cast %239 : vector<1xf32> to vector<1x1xf32>
    %241 = tpu.reciprocal %240 {approx = true} : vector<1x1xf32> -> vector<1x1xf32>
    %242 = arith.mulf %240, %241 : vector<1x1xf32>
    %cst_123 = arith.constant 2.000000e+00 : f32
    %243 = vector.broadcast %cst_123 : f32 to vector<1x1xf32>
    %244 = arith.subf %243, %242 : vector<1x1xf32>
    %245 = arith.mulf %241, %244 : vector<1x1xf32>
    %246 = vector.broadcast %245 : vector<1x1xf32> to vector<1x4xf32>
    %247 = arith.mulf %238, %246 : vector<1x4xf32>
    %c0_124 = arith.constant 0 : index
    %c0_125 = arith.constant 0 : index
    %248 = vector.load %arg10[%c0_124, %c0_125] : memref<1x4xf32, #tpu.memory_space<vmem>>, vector<1x4xf32>
    tpu.vector_store %arg10[%c0_124, %c0_125], %247 {strides = array<i32>} : memref<1x4xf32, #tpu.memory_space<vmem>>, vector<1x4xf32>,
    return
  }
}

</mosaic_0001>

<bundles_post_ra>
// kernel: attention_gru_forward.1
= control target key start
LH: loop header
LB: loop body
LE: loop exit
PB: predicated region body
PF: predicated region fallthrough
CT: control target
= control target key end

     0   :  { %15 = vsyncpa [#allocation7], 0  ;;  %s1897_s0 = inlined_call_operand.vmem [shape: s32[12], index: 0, kind: input, shape index: {}]   ;;  %s1898_s1 = inlined_call_operand.vmem [shape: f32[9,128], index: 1, kind: input, shape index: {}]   ;;  %s1899_s2 = inlined_call_operand.hbm [shape: f32[128,128], index: 2, kind: input, shape index: {}]   ;;  %s1900_s3 = inlined_call_operand.hbm [shape: f32[512,128], index: 3, kind: input, shape index: {}]   ;;  %s1901_s4 = inlined_call_operand.vmem [shape: f32[1,512], index: 4, kind: input, shape index: {}]   ;;  %s1902_s5 = inlined_call_operand.hbm [shape: f32[256,128], index: 5, kind: input, shape index: {}]   ;;  %s1903_s6 = inlined_call_operand.hbm [shape: f32[128,128], index: 6, kind: input, shape index: {}]   ;;  %s1904_s7 = inlined_call_operand.vmem [shape: f32[4,128], index: 7, kind: input, shape index: {}]   ;;  %s1905_s8 = inlined_call_operand.vmem [shape: f32[1,4], index: 8, kind: input, shape index: {}]   ;;  %s1906_s9 = inlined_call_operand.vmem [shape: f32[3,2,6], index: 9, kind: input, shape index: {}]   ;;  %s1907_s10 = inlined_call_operand.hbm [shape: f32[1,4], index: 10, kind: output, shape index: {}]  }
   0x1   :  { %16 = vsyncpa [#allocation5], 0 }
   0x2   :  { %17 = vsyncpa [#allocation10], 0 }
   0x3   :  { %18 = vsyncpa [#allocation13], 0 }
   0x4   :  { %19 = vsyncpa [#allocation6], 0  ;;  %s48_s15 = sshll.u32 %s1900_s3, 4  ;;  %s1477_s16 = smov [#allocation9]   ;;  %s49_s15 = int_to_ptr.hbm [resolvable:$true] %s48_s15 }
   0x5   :  { %s50_s17 = sshll.u32 %s1477_s16, 4  ;;  %s25_s20 = sshll.u32 %s1897_s0, 4  ;;  %s51_s17 = int_to_ptr.vmem [resolvable:$true] %s50_s17  ;;  %s26_s20 = int_to_ptr.vmem [resolvable:$true] %s25_s20 }
   0x6   :  { %s1478_s21 = smov 128   ;;  %s1479_s22 = smov 8  }
   0x7   :  { %56 = dma.hbm_to_vmem [thread:$0]  %s49_s15, 8192, %s51_s17, [#allocation10], %s1478_s21, %s1478_s21, %s1479_s22  }
   0x8   :  { %s1480_s23 = smov [#allocation4]   ;;  %s35_s26 = sshll.u32 %s1899_s2, 4  ;;  %s36_s26 = int_to_ptr.hbm [resolvable:$true] %s35_s26 }
   0x9   :  { %28 = dma.vmem_to_smem %s26_s20, 16, %s1480_s23, [#allocation7]  }
   0xa   :  { %s1481_s3 = smov [#allocation8]   ;;  %s63_s30 = sshll.u32 %s1902_s5, 4  ;;  %s64_s30 = int_to_ptr.hbm [resolvable:$true] %s63_s30 }
   0xb   :  { %s37_s27 = sshll.u32 %s1481_s3, 4  ;;  %s1482_s0 = smov [#allocation11]   ;;  %s38_s27 = int_to_ptr.vmem [resolvable:$true] %s37_s27 }
   0xc   :  { %43 = dma.hbm_to_vmem [thread:$0]  %s36_s26, 2048, %s38_s27, [#allocation5], %s1478_s21, %s1478_s21, %s1479_s22  }
   0xd   :  { %s65_s11 = sshll.u32 %s1482_s0, 4  ;;  %s76_s14 = sshll.u32 %s1903_s6, 4  ;;  %s66_s11 = int_to_ptr.vmem [resolvable:$true] %s65_s11  ;;  %s77_s14 = int_to_ptr.hbm [resolvable:$true] %s76_s14 }
   0xe   :  { %71 = dma.hbm_to_vmem [thread:$0]  %s64_s30, 4096, %s66_s11, [#allocation10], %s1478_s21, %s1478_s21, %s1479_s22  }
   0xf   :  { %s1483_s2 = smov [#allocation12]  }
  0x10   :  { %s78_s15 = sshll.u32 %s1483_s2, 4  ;;  %s79_s15 = int_to_ptr.vmem [resolvable:$true] %s78_s15 }
  0x11   :  { %84 = dma.hbm_to_vmem [thread:$0]  %s77_s14, 2048, %s79_s15, [#allocation13], %s1478_s21, %s1478_s21, %s1479_s22  }
  0x12   :  { %1467 = dma.done.wait [#allocation7], 16  }
  0x13   :  { %1468 = vsyncadd [#allocation7], 4294967280 }
  0x14   :  { %1469 = dma.done.wait [#allocation5], 2048  }
  0x15   :  { %1470 = vsyncadd [#allocation5], 4294965248 }
  0x16   :  { %1471 = dma.done.wait [#allocation10], 12288  }
  0x17   :  { %1472 = vsyncadd [#allocation10], 4294955008 }
  0x18   :  { %1473 = dma.done.wait [#allocation13], 2048  }
  0x19   :  { %1474 = vsyncadd [#allocation13], 4294965248 }
  0x1a   :  { %111 = sfence }
  0x1b   :  { %v129_v0 = vld [vmem:[#allocation8 + $0x78] sm:$0xff]  ;;  %v128_v1 = vld [vmem:[#allocation8 + $0x70] sm:$0xff]  ;;  %v127_v2 = vld [vmem:[#allocation8 + $0x68] sm:$0xff]  ;;  %s1235_s19 = sld [smem:[#allocation4 + $0x1]]  ;;  %vm430_vm4 = vcmask 1045504   ;;  %vm411_vm9 = vcmask 41984  }
  0x1c   :  { %130 = vmatpush.xpose.msra.mxu0 %v129_v0  ;;  %v126_v3 = vld [vmem:[#allocation8 + $0x60] sm:$0xff]  ;;  %v125_v4 = vld [vmem:[#allocation8 + $0x58] sm:$0xff]  ;;  %v124_v5 = vld [vmem:[#allocation8 + $0x50] sm:$0xff]  ;;  %s1236_s20 = sld [smem:[#allocation4 + $0x2]]  ;;  %vm426_vm10 = vcmask 48128  }
  0x1d   :  { %v123_v6 = vld [vmem:[#allocation8 + $0x48] sm:$0xff]  ;;  %v122_v7 = vld [vmem:[#allocation8 + $0x40] sm:$0xff]  ;;  %v121_v8 = vld [vmem:[#allocation8 + $0x38] sm:$0xff]  ;;  %s1237_s21 = sld [smem:[#allocation4 + $0x3]] }
  0x1e   :  { %v168_v9 = vld [vmem:[#allocation9 + $0x78] sm:$0xff]  ;;  %v120_v12 = vld [vmem:[#allocation8 + $0x30] sm:$0xff]  ;;  %v119_v16 = vld [vmem:[#allocation8 + $0x28] sm:$0xff]  ;;  %s1238_s22 = sld [smem:[#allocation4 + $0x4]] }
  0x1f   :  { %v184_v10 = vld [vmem:[#allocation9 + $0xf8] sm:$0xff]  ;;  %227 = vmatpush.xpose.msra.mxu1 %v168_v9  ;;  %v167_v13 = vld [vmem:[#allocation9 + $0x70] sm:$0xff]  ;;  %v166_v17 = vld [vmem:[#allocation9 + $0x68] sm:$0xff]  ;;  %s1239_s23 = sld [smem:[#allocation4 + $0x5]] }
  0x20   :  { %131 = vmatpush.xpose.msra.mxu0 %v128_v1  ;;  %v200_v11 = vld [vmem:[#allocation9 + $0x178] sm:$0xff]  ;;  %250 = vmatpush.xpose.msra.mxu2 %v184_v10  ;;  %v183_v14 = vld [vmem:[#allocation9 + $0xf0] sm:$0xff]  ;;  %v182_v18 = vld [vmem:[#allocation9 + $0xe8] sm:$0xff]  ;;  %s1245_s0 = sld [smem:[#allocation4 + $0x6]] }
  0x21   :  { %273 = vmatpush.xpose.msra.mxu3 %v200_v11  ;;  %v199_v15 = vld [vmem:[#allocation9 + $0x170] sm:$0xff]  ;;  %v198_v19 = vld [vmem:[#allocation9 + $0x168] sm:$0xff]  ;;  %v118_v20 = vld [vmem:[#allocation8 + $0x20] sm:$0xff]  ;;  %s347_s25 = scalar_lea.vmem [#allocation2], %s1235_s19  ;;  %s1246_s11 = sld [smem:[#allocation4 + $0x7]] }
  0x22   :  { %v165_v21 = vld [vmem:[#allocation9 + $0x60] sm:$0xff]  ;;  %v117_v24 = vld [vmem:[#allocation8 + $0x18] sm:$0xff]  ;;  %v116_v28 = vld [vmem:[#allocation8 + $0x10] sm:$0xff]  ;;  %s351_s26 = scalar_lea.vmem [#allocation2], %s1236_s20  ;;  %s1247_s12 = sld [smem:[#allocation4 + $0x8]] }
  0x23   :  { %228 = vmatpush.xpose.msra.mxu1 %v167_v13  ;;  %v181_v22 = vld [vmem:[#allocation9 + $0xe0] sm:$0xff]  ;;  %v164_v25 = vld [vmem:[#allocation9 + $0x58] sm:$0xff]  ;;  %v163_v29 = vld [vmem:[#allocation9 + $0x50] sm:$0xff]  ;;  %s355_s3 = scalar_lea.vmem [#allocation2], %s1237_s21  ;;  %s1254_s6 = sld [smem:[#allocation4 + $0x9]] }
  0x24   :  { %132 = vmatpush.xpose.msra.mxu0 %v127_v2  ;;  %251 = vmatpush.xpose.msra.mxu2 %v183_v14  ;;  %v197_v23 = vld [vmem:[#allocation9 + $0x160] sm:$0xff]  ;;  %v180_v26 = vld [vmem:[#allocation9 + $0xd8] sm:$0xff]  ;;  %v179_v30 = vld [vmem:[#allocation9 + $0xd0] sm:$0xff]  ;;  %s359_s27 = scalar_lea.vmem [#allocation2], %s1238_s22  ;;  %s1255_s16 = sld [smem:[#allocation4 + $0xa]] }
  0x25   :  { %274 = vmatpush.xpose.msra.mxu3 %v199_v15  ;;  %v196_v27 = vld [vmem:[#allocation9 + $0x158] sm:$0xff]  ;;  %v195_v31 = vld [vmem:[#allocation9 + $0x150] sm:$0xff]  ;;  %v115_v32 = vld [vmem:[#allocation8 + $0x8] sm:$0xff]  ;;  %s363_s28 = scalar_lea.vmem [#allocation2], %s1239_s23  ;;  %s1256_s17 = sld [smem:[#allocation4 + $0xb]] }
  0x26   :  { %v162_v33 = vld [vmem:[#allocation9 + $0x48] sm:$0xff]  ;;  %v114_v36 = vld [vmem:[#allocation8] sm:$0xff]  ;;  %v216_v38 = vld [vmem:[#allocation9 + $0x1f8] sm:$0xff]  ;;  %s635_s13 = scalar_lea.vmem [#allocation2], %s1245_s0 }
  0x27   :  { %229 = vmatpush.xpose.msra.mxu1 %v166_v17  ;;  %v178_v34 = vld [vmem:[#allocation9 + $0xc8] sm:$0xff]  ;;  %v161_v37 = vld [vmem:[#allocation9 + $0x40] sm:$0xff]  ;;  %v160_v42 = vld [vmem:[#allocation9 + $0x38] sm:$0xff]  ;;  %s639_s14 = scalar_lea.vmem [#allocation2], %s1246_s11 }
  0x28   :  { %133 = vmatpush.xpose.msra.mxu0 %v126_v3  ;;  %252 = vmatpush.xpose.msra.mxu2 %v182_v18  ;;  %v194_v35 = vld [vmem:[#allocation9 + $0x148] sm:$0xff]  ;;  %v177_v39 = vld [vmem:[#allocation9 + $0xc0] sm:$0xff]  ;;  %v215_v43 = vld [vmem:[#allocation9 + $0x1f0] sm:$0xff]  ;;  %s643_s2 = scalar_lea.vmem [#allocation2], %s1247_s12 }
  0x29   :  { %275 = vmatpush.xpose.msra.mxu3 %v198_v19  ;;  %v193_v40 = vld [vmem:[#allocation9 + $0x140] sm:$0xff]  ;;  %v112_v41 = vld [vmem:[%s1898_s1] sm:$0xff]  ;;  %v176_v44 = vld [vmem:[#allocation9 + $0xb8] sm:$0xff] }
  0x2a   :  { %v192_v45 = vld [vmem:[#allocation9 + $0x138] sm:$0xff]  ;;  %v159_v46 = vld [vmem:[#allocation9 + $0x30] sm:$0xff]  ;;  %v214_v47 = vld [vmem:[#allocation9 + $0x1e8] sm:$0xff]  ;;  %s911_s18 = scalar_lea.vmem [#allocation2], %s1255_s16 }
  0x2b   :  { %230 = vmatpush.xpose.msra.mxu1 %v165_v21  ;;  %v175_v48 = vld [vmem:[#allocation9 + $0xb0] sm:$0xff]  ;;  %v158_v50 = vld [vmem:[#allocation9 + $0x28] sm:$0xff]  ;;  %v213_v51 = vld [vmem:[#allocation9 + $0x1e0] sm:$0xff] }
  0x2c   :  { %134 = vmatpush.xpose.msra.mxu0 %v125_v4  ;;  %253 = vmatpush.xpose.msra.mxu2 %v181_v22  ;;  %v191_v49 = vld [vmem:[#allocation9 + $0x130] sm:$0xff]  ;;  %v174_v52 = vld [vmem:[#allocation9 + $0xa8] sm:$0xff]  ;;  %v157_v54 = vld [vmem:[#allocation9 + $0x20] sm:$0xff] }
  0x2d   :  { %276 = vmatpush.xpose.msra.mxu3 %v197_v23  ;;  %v190_v53 = vld [vmem:[#allocation9 + $0x128] sm:$0xff]  ;;  %v212_v55 = vld [vmem:[#allocation9 + $0x1d8] sm:$0xff]  ;;  %v173_v56 = vld [vmem:[#allocation9 + $0xa0] sm:$0xff] }
  0x2e   :  { %v189_v57 = vld [vmem:[#allocation9 + $0x120] sm:$0xff]  ;;  %v156_v58 = vld [vmem:[#allocation9 + $0x18] sm:$0xff]  ;;  %v211_v59 = vld [vmem:[#allocation9 + $0x1d0] sm:$0xff] }
  0x2f   :  { %231 = vmatpush.xpose.msra.mxu1 %v164_v25  ;;  %v172_v60 = vld [vmem:[#allocation9 + $0x98] sm:$0xff]  ;;  %v155_v62 = vld [vmem:[#allocation9 + $0x10] sm:$0xff]  ;;  %v210_v0 = vld [vmem:[#allocation9 + $0x1c8] sm:$0xff] }
  0x30   :  { %135 = vmatpush.xpose.msra.mxu0 %v124_v5  ;;  %254 = vmatpush.xpose.msra.mxu2 %v180_v26  ;;  %v188_v61 = vld [vmem:[#allocation9 + $0x118] sm:$0xff]  ;;  %v113_v63 = vld [vmem:[%s1898_s1 + $0x8] sm:$0x1]  ;;  %v154_v3 = vld [vmem:[#allocation9 + $0x8] sm:$0xff]  ;;  %s907_s1 = scalar_lea.vmem [#allocation2], %s1254_s6 }
  0x31   :  { %277 = vmatpush.xpose.msra.mxu3 %v196_v27  ;;  %v171_v1 = vld [vmem:[#allocation9 + $0x90] sm:$0xff]  ;;  %v209_v4 = vld [vmem:[#allocation9 + $0x1c0] sm:$0xff]  ;;  %v170_v5 = vld [vmem:[#allocation9 + $0x88] sm:$0xff] }
  0x32   :  { %v187_v2 = vld [vmem:[#allocation9 + $0x110] sm:$0xff]  ;;  %v169_v9 = vld [vmem:[#allocation9 + $0x80] sm:$0xff]  ;;  %v204_v14 = vld [vmem:[#allocation9 + $0x198] sm:$0xff] }
  0x33   :  { %232 = vmatpush.xpose.msra.mxu1 %v163_v29  ;;  %v185_v10 = vld [vmem:[#allocation9 + $0x100] sm:$0xff]  ;;  %v207_v11 = vld [vmem:[#allocation9 + $0x1b0] sm:$0xff] }
  0x34   :  { %136 = vmatpush.xpose.msra.mxu0 %v123_v6  ;;  %255 = vmatpush.xpose.msra.mxu2 %v179_v30  ;;  %v186_v6 = vld [vmem:[#allocation9 + $0x108] sm:$0xff]  ;;  %v205_v13 = vld [vmem:[#allocation9 + $0x1a0] sm:$0xff]  ;;  %v203_v15 = vld [vmem:[#allocation9 + $0x190] sm:$0xff] }
  0x35   :  { %278 = vmatpush.xpose.msra.mxu3 %v195_v31  ;;  %v201_v17 = vld [vmem:[#allocation9 + $0x180] sm:$0xff] }
  0x37   :  { %233 = vmatpush.xpose.msra.mxu1 %v162_v33 }
  0x38   :  { %137 = vmatpush.xpose.msra.mxu0 %v122_v7  ;;  %256 = vmatpush.xpose.msra.mxu2 %v178_v34  ;;  %v153_v7 = vld [vmem:[#allocation9] sm:$0xff] }
  0x39   :  { %279 = vmatpush.xpose.msra.mxu3 %v194_v35 }
  0x3b   :  { %234 = vmatpush.xpose.msra.mxu1 %v161_v37 }
  0x3c   :  { %138 = vmatpush.xpose.msra.mxu0 %v121_v8  ;;  %257 = vmatpush.xpose.msra.mxu2 %v177_v39  ;;  %v208_v8 = vld [vmem:[#allocation9 + $0x1b8] sm:$0xff] }
  0x3d   :  { %280 = vmatpush.xpose.msra.mxu3 %v193_v40 }
  0x3f   :  { %235 = vmatpush.xpose.msra.mxu1 %v160_v42 }
  0x40   :  { %139 = vmatpush.xpose.msra.mxu0 %v120_v12  ;;  %258 = vmatpush.xpose.msra.mxu2 %v176_v44  ;;  %v206_v12 = vld [vmem:[#allocation9 + $0x1a8] sm:$0xff] }
  0x41   :  { %281 = vmatpush.xpose.msra.mxu3 %v192_v45 }
  0x43   :  { %236 = vmatpush.xpose.msra.mxu1 %v159_v46 }
  0x44   :  { %140 = vmatpush.xpose.msra.mxu0 %v119_v16  ;;  %259 = vmatpush.xpose.msra.mxu2 %v175_v48  ;;  %v202_v16 = vld [vmem:[#allocation9 + $0x188] sm:$0xff] }
  0x45   :  { %282 = vmatpush.xpose.msra.mxu3 %v191_v49 }
  0x47   :  { %237 = vmatpush.xpose.msra.mxu1 %v158_v50 }
  0x48   :  { %141 = vmatpush.xpose.msra.mxu0 %v118_v20  ;;  %260 = vmatpush.xpose.msra.mxu2 %v174_v52  ;;  %v1564_v20 = vld [vmem:[%s1901_s4] sm:$0xf]  ;;  %s342_s4 = sld [smem:[#allocation4]] }
  0x49   :  { %283 = vmatpush.xpose.msra.mxu3 %v190_v53  ;;  %v219_v21 = vperm.slane %v1564_v20, 0  ;;  %v221_v27 = vperm.slane %v1564_v20, 2  ;;  %v222_v49 = vperm.slane %v1564_v20, 3 }
  0x4b   :  { %238 = vmatpush.xpose.msra.mxu1 %v157_v54 }
  0x4c   :  { %142 = vmatpush.xpose.msra.mxu0 %v117_v24  ;;  %261 = vmatpush.xpose.msra.mxu2 %v173_v56 }
  0x4d   :  { %284 = vmatpush.xpose.msra.mxu3 %v189_v57 }
  0x4e   :  { %s343_s24 = scalar_lea.vmem [#allocation2], %s342_s4  ;;  %s915_s4 = scalar_lea.vmem [#allocation2], %s1256_s17 }
  0x4f   :  { %239 = vmatpush.xpose.msra.mxu1 %v156_v58 }
  0x50   :  { %143 = vmatpush.xpose.msra.mxu0 %v116_v28  ;;  %262 = vmatpush.xpose.msra.mxu2 %v172_v60 }
  0x51   :  { %285 = vmatpush.xpose.msra.mxu3 %v188_v61 }
  0x53   :  { %240 = vmatpush.xpose.msra.mxu1 %v155_v62 }
  0x54   :  { %144 = vmatpush.xpose.msra.mxu0 %v115_v32  ;;  %263 = vmatpush.xpose.msra.mxu2 %v171_v1 }
  0x55   :  { %286 = vmatpush.xpose.msra.mxu3 %v187_v2 }
  0x57   :  { %241 = vmatpush.xpose.msra.mxu1 %v154_v3  ;;  %v409_v3 = vld [vmem:[%s1906_s9] sm:$0x3] }
  0x58   :  { %145 = vmatpush.xpose.msra.mxu0 %v114_v36  ;;  %264 = vmatpush.xpose.msra.mxu2 %v170_v5 }
  0x59   :  { %287 = vmatpush.xpose.msra.mxu3 %v186_v6 }
  0x5b   :  { %146 = vmatmul.f32.vlgmr.msra.gmra.mxu0 %v112_v41  ;;  %242 = vmatpush.xpose.msra.mxu1 %v153_v7 }
  0x5c   :  { %296 = vmatpush.xpose.msrb.mxu0 %v216_v38  ;;  %265 = vmatpush.xpose.msra.mxu2 %v169_v9 }
  0x5d   :  { %288 = vmatpush.xpose.msra.mxu3 %v185_v10 }
  0x60   :  { %297 = vmatpush.xpose.msrb.mxu0 %v215_v43 }
  0x63   :  { %149 = vmatmul.f32.gmra.mxu0 %v113_v63 }
  0x64   :  { %298 = vmatpush.xpose.msrb.mxu0 %v214_v47 }
  0x68   :  { %299 = vmatpush.xpose.msrb.mxu0 %v213_v51 }
  0x6c   :  { %300 = vmatpush.xpose.msrb.mxu0 %v212_v55 }
  0x70   :  { %301 = vmatpush.xpose.msrb.mxu0 %v211_v59 }
  0x74   :  { %302 = vmatpush.xpose.msrb.mxu0 %v210_v0 }
  0x78   :  { %303 = vmatpush.xpose.msrb.mxu0 %v209_v4 }
  0x7c   :  { %304 = vmatpush.xpose.msrb.mxu0 %v208_v8 }
  0x80   :  { %305 = vmatpush.xpose.msrb.mxu0 %v207_v11 }
  0x84   :  { %306 = vmatpush.xpose.msrb.mxu0 %v206_v12 }
  0x88   :  { %307 = vmatpush.xpose.msrb.mxu0 %v205_v13  ;;  %v1589_v13 = vld [vmem:[#allocation11 + $0x78] sm:$0xff] }
  0x89   :  { %486 = vmatpush.xpose.msrb.mxu3 %v1589_v13 }
  0x8c   :  { %308 = vmatpush.xpose.msrb.mxu0 %v204_v14  ;;  %v1591_v14 = vld [vmem:[#allocation11 + $0xf8] sm:$0xff] }
  0x90   :  { %309 = vmatpush.xpose.msrb.mxu0 %v203_v15  ;;  %v1595_v15 = vld [vmem:[#allocation11 + $0x70] sm:$0xff] }
  0x91   :  { %487 = vmatpush.xpose.msrb.mxu3 %v1595_v15 }
  0x94   :  { %310 = vmatpush.xpose.msrb.mxu0 %v202_v16  ;;  %v1597_v16 = vld [vmem:[#allocation11 + $0xf0] sm:$0xff] }
  0x98   :  { %311 = vmatpush.xpose.msrb.mxu0 %v201_v17  ;;  %v1602_v17 = vld [vmem:[#allocation11 + $0x68] sm:$0xff] }
  0x99   :  { %488 = vmatpush.xpose.msrb.mxu3 %v1602_v17 }
  0x9c   :  { %786 = vmatpush.xpose.msra.mxu0 %v1591_v14 }
  0xa0   :  { %787 = vmatpush.xpose.msra.mxu0 %v1597_v16 }
  0xd8   :  { %v147_v18 = vpop.f32.mrf.mxu0 }
  0xd9   :  { %243 = vmatmul.f32.vlgmr.msra.gmra.mxu1 %v147_v18  ;;  %266 = vmatmul.f32.vlgmr.msra.gmra.mxu2 %v147_v18 }
  0xda   :  { %289 = vmatmul.f32.vlgmr.msra.gmra.mxu3 %v147_v18  ;;  %312 = vmatmul.f32.vlgmr.msrb.gmra.mxu0 %v147_v18  ;;  %v1604_v18 = vld [vmem:[#allocation11 + $0xe8] sm:$0xff] }
  0xdb   :  { %788 = vmatpush.xpose.msra.mxu0 %v1604_v18 }
  0xe0   :  { %v150_v19 = vpop.f32.mrf.mxu0 }
  0xe1   :  { %246 = vmatmul.f32.gmra.mxu1 %v150_v19  ;;  %269 = vmatmul.f32.gmra.mxu2 %v150_v19 }
  0xe2   :  { %292 = vmatmul.f32.gmra.mxu3 %v150_v19  ;;  %315 = vmatmul.f32.gmra.mxu0 %v150_v19  ;;  %v1609_v19 = vld [vmem:[#allocation11 + $0x60] sm:$0xff] }
  0xe3   :  { %489 = vmatpush.xpose.msrb.mxu3 %v1609_v19 }
 0x156   :  { %v244_v22 = vpop.f32.mrf.mxu1 }
 0x157   :  { %v1569_v23 = vadd.f32 %v244_v22, %v219_v21  ;;  %v313_v50 = vpop.f32.mrf.mxu0  ;;  %v1611_v22 = vld [vmem:[#allocation11 + $0xe0] sm:$0xff] }
 0x158   :  { %v1581_v51 = vadd.f32 %v313_v50, %v222_v49  ;;  %789 = vmatpush.xpose.msra.mxu0 %v1611_v22  ;;  %v1674_v50 = vld [vmem:[#allocation11 + $0x98] sm:$0xff] }
 0x159   :  { %v1234_v24 = vmul.f32 -1.442695, %v1569_v23 }
 0x15a   :  { %v368_v53 = vrot.slane %v1581_v51, 5 }
 0x15b   :  { %1271 = vpow2.f32 %v1234_v24  ;;  %v1616_v24 = vld [vmem:[#allocation11 + $0x58] sm:$0xff] }
 0x15c   :  { %490 = vmatpush.xpose.msrb.mxu3 %v1616_v24 }
 0x15d   :  { %v290_v28 = vpop.f32.mrf.mxu3 }
 0x15e   :  { %v1575_v31 = vadd.f32 %v290_v28, %v221_v27  ;;  %v1584_v54 = vpop.f32.mrf.mxu1  ;;  %v1623_v28 = vld [vmem:[#allocation11 + $0x50] sm:$0xff] }
 0x160   :  { %491 = vmatpush.xpose.msrb.mxu3 %v1623_v28 }
 0x161   :  { %v1272_v25 = vpop.eup %1271 }
 0x162   :  { %v322_v26 = vadd.f32 1.0, %v1272_v25  ;;  %v1618_v25 = vld [vmem:[#allocation11 + $0xd8] sm:$0xff] }
 0x163   :  { %790 = vmatpush.xpose.msra.mxu0 %v1618_v25 }
 0x164   :  { %1273 = vrcp.f32 %v322_v26  ;;  %v334_v33 = vand.u32 2147483648, %v322_v26  ;;  %v332_v35 = vand.u32 2147483647, %v322_v26  ;;  %vm328_vm1 = vweird.f32 %v322_v26 }
 0x165   :  { %1275 = vtanh.f32 %v1575_v31 }
 0x166   :  { %v335_v37 = vor.u32 1.1754944e-38, %v334_v33  ;;  %vm333_vm3 = vcmp.eq.f32.partialorder %v332_v35, 8.507059e+37 }
 0x16a   :  { %v1274_v29 = vpop.eup %1273 }
 0x16b   :  { %v324_v30 = vmul.f32 %v1274_v29, %v322_v26  ;;  %vm329_vm0 = vweird.f32 %v1274_v29  ;;  %v1276_v41 = vpop.eup %1275 }
 0x16c   :  { %vm330_vm2 = vmor %vm328_vm1, %vm329_vm0 }
 0x16d   :  { %v325_v32 = vsub.f32 1.0, %v324_v30  ;;  %v1630_v30 = vld [vmem:[#allocation11 + $0x48] sm:$0xff] }
 0x16e   :  { %492 = vmatpush.xpose.msrb.mxu3 %v1630_v30 }
 0x16f   :  { %v326_v34 = vmul.f32 %v1274_v29, %v325_v32  ;;  %v1632_v32 = vld [vmem:[#allocation11 + $0xc8] sm:$0xff] }
 0x171   :  { %v327_v36 = vadd.f32 %v1274_v29, %v326_v34 }
 0x173   :  { %v331_v38 = vsel %vm330_vm2, %v1274_v29, %v327_v36  ;;  %v1625_v29 = vld [vmem:[#allocation11 + $0xd0] sm:$0xff]  ;;  %v1637_v36 = vld [vmem:[#allocation11 + $0x40] sm:$0xff] }
 0x174   :  { %v336_v39 = vsel %vm333_vm3, %v335_v37, %v331_v38  ;;  %791 = vmatpush.xpose.msra.mxu0 %v1625_v29  ;;  %v1639_v37 = vld [vmem:[#allocation11 + $0xc0] sm:$0xff]  ;;  %493 = vmatpush.xpose.msrb.mxu3 %v1637_v36  ;;  %vm710_vm3 = vcmask 1042432  }
 0x175   :  { %v338_v40 = vsub.f32 1.0, %v336_v39 }
 0x177   :  { %v340_v42 = vmul.f32 %v1276_v41, %v338_v40  ;;  %v1644_v40 = vld [vmem:[#allocation11 + $0x38] sm:$0xff] }
 0x178   :  { %792 = vmatpush.xpose.msra.mxu0 %v1632_v32  ;;  %v1646_v41 = vld [vmem:[#allocation11 + $0xb8] sm:$0xff]  ;;  %494 = vmatpush.xpose.msrb.mxu3 %v1644_v40 }
 0x179   :  { %341 = vst [vmem:[#allocation2] sm:$0x1f] %v340_v42  ;;  %v1651_v42 = vld [vmem:[#allocation11 + $0x30] sm:$0xff] }
 0x17c   :  { %793 = vmatpush.xpose.msra.mxu0 %v1639_v37  ;;  %495 = vmatpush.xpose.msrb.mxu3 %v1651_v42 }
 0x180   :  { %v344_v43 = vld [vmem:[%s343_s24] sm:$0x1]  ;;  %794 = vmatpush.xpose.msra.mxu0 %v1646_v41 }
 0x181   :  { %v348_v44 = vld [vmem:[%s347_s25] sm:$0x1]  ;;  %345 = vst [vmem:[#allocation3] sm:$0x1] %v344_v43  ;;  %v1653_v43 = vld [vmem:[#allocation11 + $0xb0] sm:$0xff] }
 0x182   :  { %v352_v45 = vld [vmem:[%s351_s26] sm:$0x1]  ;;  %349 = vst [vmem:[#allocation3 + $0x1] sm:$0x1] %v348_v44  ;;  %s1209_s26 = sshll.u32 %s1907_s10, 4  ;;  %s1210_s26 = int_to_ptr.hbm [resolvable:$true] %s1209_s26 }
 0x183   :  { %v356_v46 = vld [vmem:[%s355_s3] sm:$0x1]  ;;  %353 = vst [vmem:[#allocation3 + $0x2] sm:$0x1] %v352_v45 }
 0x184   :  { %v360_v47 = vld [vmem:[%s359_s27] sm:$0x1]  ;;  %357 = vst [vmem:[#allocation3 + $0x3] sm:$0x1] %v356_v46  ;;  %795 = vmatpush.xpose.msra.mxu0 %v1653_v43  ;;  %v1665_v46 = vld [vmem:[#allocation11 + $0x20] sm:$0xff] }
 0x185   :  { %v364_v48 = vld [vmem:[%s363_s28] sm:$0x1]  ;;  %361 = vst [vmem:[#allocation3 + $0x4] sm:$0x1] %v360_v47  ;;  %v1667_v47 = vld [vmem:[#allocation11 + $0xa0] sm:$0xff] }
 0x186   :  { %365 = vst [vmem:[#allocation3 + $0x5] sm:$0x1] %v364_v48  ;;  %v1658_v44 = vld [vmem:[#allocation11 + $0x28] sm:$0xff]  ;;  %v1672_v48 = vld [vmem:[#allocation11 + $0x18] sm:$0xff] }
 0x187   :  { %v1660_v45 = vld [vmem:[#allocation11 + $0xa8] sm:$0xff]  ;;  %496 = vmatpush.xpose.msrb.mxu3 %v1658_v44 }
 0x188   :  { %796 = vmatpush.xpose.msra.mxu0 %v1660_v45 }
 0x18b   :  { %497 = vmatpush.xpose.msrb.mxu3 %v1665_v46 }
 0x18c   :  { %797 = vmatpush.xpose.msra.mxu0 %v1667_v47 }
 0x18d   :  { %v366_v52 = vld [vmem:[#allocation3] sm:$0x3f] }
 0x18e   :  { %385 = vmatpush.xpose.msrb.mxu1 %v366_v52  ;;  %1241 = vmatpush.msk.msrb.mxu2 %vm430_vm4, %v366_v52  ;;  %v1679_v52 = vld [vmem:[#allocation11 + $0x10] sm:$0xff] }
 0x18f   :  { %498 = vmatpush.xpose.msrb.mxu3 %v1672_v48 }
 0x190   :  { %798 = vmatpush.xpose.msra.mxu0 %v1674_v50 }
 0x191   :  { %386 = vmatmul.f32.vlgmr.msrb.gmra.mxu1 %v368_v53  ;;  %v1681_v53 = vld [vmem:[#allocation11 + $0x90] sm:$0xff] }
 0x192   :  { %506 = vmatpush.xpose.msra.mxu1 %v1591_v14 }
 0x193   :  { %499 = vmatpush.xpose.msrb.mxu3 %v1679_v52 }
 0x194   :  { %799 = vmatpush.xpose.msra.mxu0 %v1681_v53 }
 0x196   :  { %507 = vmatpush.xpose.msra.mxu1 %v1597_v16 }
 0x19a   :  { %508 = vmatpush.xpose.msra.mxu1 %v1604_v18 }
 0x19e   :  { %509 = vmatpush.xpose.msra.mxu1 %v1611_v22 }
 0x1a2   :  { %510 = vmatpush.xpose.msra.mxu1 %v1618_v25 }
 0x1a6   :  { %511 = vmatpush.xpose.msra.mxu1 %v1625_v29 }
 0x1aa   :  { %512 = vmatpush.xpose.msra.mxu1 %v1632_v32 }
 0x1ae   :  { %513 = vmatpush.xpose.msra.mxu1 %v1639_v37 }
 0x1b2   :  { %514 = vmatpush.xpose.msra.mxu1 %v1646_v41 }
 0x1b6   :  { %515 = vmatpush.xpose.msra.mxu1 %v1653_v43 }
 0x1ba   :  { %516 = vmatpush.xpose.msra.mxu1 %v1660_v45 }
 0x1be   :  { %517 = vmatpush.xpose.msra.mxu1 %v1667_v47 }
 0x1c2   :  { %518 = vmatpush.xpose.msra.mxu1 %v1674_v50 }
 0x1c6   :  { %519 = vmatpush.xpose.msra.mxu1 %v1681_v53 }
 0x20e   :  { %v387_v55 = vpop.f32.mrf.mxu1 }
 0x20f   :  { %v1240_v56 = vmul.f32 -1.442695, %v387_v55  ;;  %v1686_v55 = vld [vmem:[#allocation11 + $0x8] sm:$0xff] }
 0x210   :  { %500 = vmatpush.xpose.msrb.mxu3 %v1686_v55 }
 0x211   :  { %1277 = vpow2.f32 %v1240_v56  ;;  %v1688_v56 = vld [vmem:[#allocation11 + $0x88] sm:$0xff] }
 0x212   :  { %520 = vmatpush.xpose.msra.mxu1 %v1688_v56  ;;  %800 = vmatpush.xpose.msra.mxu0 %v1688_v56 }
 0x217   :  { %v1278_v57 = vpop.eup %1277 }
 0x218   :  { %v393_v58 = vadd.f32 1.0, %v1278_v57  ;;  %v1693_v57 = vld [vmem:[#allocation11] sm:$0xff] }
 0x219   :  { %501 = vmatpush.xpose.msrb.mxu3 %v1693_v57 }
 0x21a   :  { %1279 = vrcp.f32 %v393_v58  ;;  %v405_v62 = vand.u32 2147483648, %v393_v58  ;;  %v403_v0 = vand.u32 2147483647, %v393_v58  ;;  %vm399_vm6 = vweird.f32 %v393_v58 }
 0x21c   :  { %v406_v2 = vor.u32 1.1754944e-38, %v405_v62  ;;  %vm404_vm8 = vcmp.eq.f32.partialorder %v403_v0, 8.507059e+37  ;;  %v1725_v62 = vld [vmem:[#allocation12 + $0x60] sm:$0xff]  ;;  %v267_v0 = vpop.f32.mrf.mxu2 }
 0x21d   :  { %766 = vmatpush.xpose.msra.mxu3 %v1589_v13 }
 0x220   :  { %v1280_v59 = vpop.eup %1279 }
 0x221   :  { %v395_v60 = vmul.f32 %v1280_v59, %v393_v58  ;;  %vm400_vm5 = vweird.f32 %v1280_v59  ;;  %v470_v58 = vld [vmem:[#allocation11 + $0x80] sm:$0xff]  ;;  %767 = vmatpush.xpose.msra.mxu3 %v1595_v15 }
 0x222   :  { %vm401_vm7 = vmor %vm399_vm6, %vm400_vm5  ;;  %521 = vmatpush.xpose.msra.mxu1 %v470_v58  ;;  %801 = vmatpush.xpose.msra.mxu0 %v470_v58 }
 0x223   :  { %v396_v61 = vsub.f32 1.0, %v395_v60  ;;  %v1717_v60 = vld [vmem:[#allocation12 + $0x70] sm:$0xff] }
 0x225   :  { %v397_v63 = vmul.f32 %v1280_v59, %v396_v61  ;;  %768 = vmatpush.xpose.msra.mxu3 %v1602_v17  ;;  %v1721_v61 = vld [vmem:[#allocation12 + $0x68] sm:$0xff] }
 0x227   :  { %v398_v1 = vadd.f32 %v1280_v59, %v397_v63  ;;  %v1729_v63 = vld [vmem:[#allocation12 + $0x58] sm:$0xff] }
 0x229   :  { %v402_v4 = vsel %vm401_vm7, %v1280_v59, %v398_v1  ;;  %769 = vmatpush.xpose.msra.mxu3 %v1609_v19  ;;  %v1713_v59 = vld [vmem:[#allocation12 + $0x78] sm:$0xff]  ;;  %v1733_v1 = vld [vmem:[#allocation12 + $0x50] sm:$0xff] }
 0x22a   :  { %v407_v5 = vsel %vm404_vm8, %v406_v2, %v402_v4  ;;  %595 = vmatpush.xpose.msra.mxu2 %v1713_v59  ;;  %1130 = vmatpush.xpose.msrb.mxu0 %v1713_v59  ;;  %v1737_v2 = vld [vmem:[#allocation12 + $0x48] sm:$0xff]  ;;  %vm691_vm8 = vcmask 16384  }
 0x22b   :  { %v410_v6 = vadd.f32 %v409_v3, %v407_v5  ;;  %v1739_v3 = vpop.f32.mrf.mxu2  ;;  %v1762_v5 = vld [vmem:[#allocation12 + $0x40] sm:$0xff] }
 0x22d   :  { %v412_v7 = vsel %vm411_vm9, %v410_v6, -inf  ;;  %770 = vmatpush.xpose.msra.mxu3 %v1616_v24 }
 0x22e   :  { %413 = vmax.xlane.f32.xlu0 %v412_v7  ;;  %596 = vmatpush.xpose.msra.mxu2 %v1717_v60  ;;  %v1770_v7 = vld [vmem:[#allocation12 + $0x30] sm:$0xff] }
 0x22f   :  { %1131 = vmatpush.xpose.msrb.mxu0 %v1717_v60 }
 0x231   :  { %771 = vmatpush.xpose.msra.mxu3 %v1623_v28 }
 0x232   :  { %597 = vmatpush.xpose.msra.mxu2 %v1721_v61 }
 0x233   :  { %1132 = vmatpush.xpose.msrb.mxu0 %v1721_v61 }
 0x235   :  { %772 = vmatpush.xpose.msra.mxu3 %v1630_v30 }
 0x236   :  { %598 = vmatpush.xpose.msra.mxu2 %v1725_v62 }
 0x237   :  { %1133 = vmatpush.xpose.msrb.mxu0 %v1725_v62 }
 0x239   :  { %773 = vmatpush.xpose.msra.mxu3 %v1637_v36 }
 0x23a   :  { %599 = vmatpush.xpose.msra.mxu2 %v1729_v63 }
 0x23b   :  { %1134 = vmatpush.xpose.msrb.mxu0 %v1729_v63 }
 0x23d   :  { %774 = vmatpush.xpose.msra.mxu3 %v1644_v40 }
 0x23e   :  { %600 = vmatpush.xpose.msra.mxu2 %v1733_v1 }
 0x23f   :  { %1135 = vmatpush.xpose.msrb.mxu0 %v1733_v1 }
 0x241   :  { %775 = vmatpush.xpose.msra.mxu3 %v1651_v42 }
 0x242   :  { %601 = vmatpush.xpose.msra.mxu2 %v1737_v2 }
 0x243   :  { %1136 = vmatpush.xpose.msrb.mxu0 %v1737_v2 }
 0x245   :  { %776 = vmatpush.xpose.msra.mxu3 %v1658_v44 }
 0x246   :  { %602 = vmatpush.xpose.msra.mxu2 %v1762_v5 }
 0x247   :  { %1137 = vmatpush.xpose.msrb.mxu0 %v1762_v5 }
 0x249   :  { %777 = vmatpush.xpose.msra.mxu3 %v1665_v46 }
 0x24d   :  { %778 = vmatpush.xpose.msra.mxu3 %v1672_v48 }
 0x251   :  { %779 = vmatpush.xpose.msra.mxu3 %v1679_v52 }
 0x255   :  { %780 = vmatpush.xpose.msra.mxu3 %v1686_v55 }
 0x259   :  { %781 = vmatpush.xpose.msra.mxu3 %v1693_v57 }
 0x2a1   :  { %v414_v8 = vpop.xlane.xlu0 %413 }
 0x2a2   :  { %v415_v9 = vsub.f32 %v410_v6, %v414_v8  ;;  %v1766_v6 = vld [vmem:[#allocation12 + $0x38] sm:$0xff]  ;;  %v1774_v8 = vld [vmem:[#allocation12 + $0x28] sm:$0xff] }
 0x2a3   :  { %603 = vmatpush.xpose.msra.mxu2 %v1766_v6  ;;  %1138 = vmatpush.xpose.msrb.mxu0 %v1766_v6 }
 0x2a4   :  { %v416_v10 = vmul.f32 1.442695, %v415_v9  ;;  %v1778_v9 = vld [vmem:[#allocation12 + $0x20] sm:$0xff] }
 0x2a6   :  { %1281 = vpow2.f32 %v416_v10  ;;  %v1782_v10 = vld [vmem:[#allocation12 + $0x18] sm:$0xff] }
 0x2a7   :  { %604 = vmatpush.xpose.msra.mxu2 %v1770_v7  ;;  %1139 = vmatpush.xpose.msrb.mxu0 %v1770_v7 }
 0x2ab   :  { %605 = vmatpush.xpose.msra.mxu2 %v1774_v8  ;;  %1140 = vmatpush.xpose.msrb.mxu0 %v1774_v8 }
 0x2ac   :  { %v1282_v11 = vpop.eup %1281 }
 0x2ad   :  { %v418_v12 = vsel %vm411_vm9, %v1282_v11, 0.0  ;;  %vm706_vm9 = vcmask 23552  }
 0x2ae   :  { %419 = vadd.xlane.f32.xlu0 %v418_v12  ;;  %v220_v12 = vperm.slane %v1564_v20, 1 }
 0x2af   :  { %606 = vmatpush.xpose.msra.mxu2 %v1778_v9  ;;  %1141 = vmatpush.xpose.msrb.mxu0 %v1778_v9 }
 0x2b3   :  { %607 = vmatpush.xpose.msra.mxu2 %v1782_v10  ;;  %1142 = vmatpush.xpose.msrb.mxu0 %v1782_v10 }
 0x321   :  { %v420_v26 = vpop.xlane.xlu0 %419 }
 0x322   :  { %1283 = vrcp.f32 %v420_v26 }
 0x328   :  { %v1284_v33 = vpop.eup %1283 }
 0x329   :  { %v422_v34 = vmul.f32 %v1284_v33, %v420_v26 }
 0x32b   :  { %v423_v35 = vsub.f32 2.0, %v422_v34 }
 0x32d   :  { %v424_v38 = vmul.f32 %v1284_v33, %v423_v35 }
 0x32f   :  { %v425_v39 = vmul.f32 %v1282_v11, %v424_v38  ;;  %v1786_v11 = vld [vmem:[#allocation12 + $0x10] sm:$0xff] }
 0x330   :  { %608 = vmatpush.xpose.msra.mxu2 %v1786_v11  ;;  %1143 = vmatpush.xpose.msrb.mxu0 %v1786_v11 }
 0x331   :  { %1242 = vmatmul.msk.f32.vlgmr.msrb.gmra.mxu2 %vm426_vm10, %v425_v39 }
 0x3b4   :  { %v1743_v4 = vpop.f32.mrf.mxu2 }
 0x3b5   :  { %502 = vmatmul.f32.vlgmr.msrb.gmra.mxu3 %v1743_v4  ;;  %522 = vmatmul.f32.vlgmr.msra.gmra.mxu1 %v1743_v4 }
 0x3b6   :  { %1053 = vmatpush.xpose.msrb.mxu3 %v1591_v14  ;;  %v1791_v14 = vld [vmem:[#allocation12 + $0x8] sm:$0xff] }
 0x3b7   :  { %609 = vmatpush.xpose.msra.mxu2 %v1791_v14  ;;  %1144 = vmatpush.xpose.msrb.mxu0 %v1791_v14 }
 0x3ba   :  { %1054 = vmatpush.xpose.msrb.mxu3 %v1597_v16 }
 0x3be   :  { %1055 = vmatpush.xpose.msrb.mxu3 %v1604_v18  ;;  %v1797_v18 = vadd.f32 %v267_v0, %v220_v12  ;;  %v1805_v0 = vpop.f32.mrf.mxu3 }
 0x3c2   :  { %1056 = vmatpush.xpose.msrb.mxu3 %v1611_v22 }
 0x3c6   :  { %1057 = vmatpush.xpose.msrb.mxu3 %v1618_v25  ;;  %v1799_v25 = vld [vmem:[#allocation12] sm:$0xff] }
 0x3c7   :  { %610 = vmatpush.xpose.msra.mxu2 %v1799_v25  ;;  %1145 = vmatpush.xpose.msrb.mxu0 %v1799_v25 }
 0x3ca   :  { %1058 = vmatpush.xpose.msrb.mxu3 %v1625_v29 }
 0x3ce   :  { %1059 = vmatpush.xpose.msrb.mxu3 %v1632_v32 }
 0x3d2   :  { %1060 = vmatpush.xpose.msrb.mxu3 %v1639_v37 }
 0x3d6   :  { %1061 = vmatpush.xpose.msrb.mxu3 %v1646_v41 }
 0x3da   :  { %1062 = vmatpush.xpose.msrb.mxu3 %v1653_v43 }
 0x3de   :  { %1063 = vmatpush.xpose.msrb.mxu3 %v1660_v45 }
 0x3e2   :  { %1064 = vmatpush.xpose.msrb.mxu3 %v1667_v47  ;;  %v573_v47 = vrot.slane %v1743_v4, 3 }
 0x3e6   :  { %1065 = vmatpush.xpose.msrb.mxu3 %v1674_v50 }
 0x3ea   :  { %1066 = vmatpush.xpose.msrb.mxu3 %v1681_v53 }
 0x3ee   :  { %1067 = vmatpush.xpose.msrb.mxu3 %v1688_v56 }
 0x3f2   :  { %1068 = vmatpush.xpose.msrb.mxu3 %v470_v58 }
 0x432   :  { %v523_v16 = vpop.f32.mrf.mxu1 }
 0x433   :  { %v529_v22 = vrot.slane %v523_v16, 3 }
 0x435   :  { %v533_v26 = vadd.f32 %v529_v22, %v1797_v18 }
 0x437   :  { %v1244_v29 = vmul.f32 -1.442695, %v533_v26 }
 0x438   :  { %v503_v16 = vpop.f32.mrf.mxu3 }
 0x439   :  { %1285 = vpow2.f32 %v1244_v29  ;;  %v528_v22 = vrot.slane %v503_v16, 3 }
 0x43b   :  { %v532_v26 = vadd.f32 %v528_v22, %v1569_v23 }
 0x43d   :  { %v1243_v29 = vmul.f32 -1.442695, %v532_v26 }
 0x43f   :  { %v1286_v32 = vpop.eup %1285 }
 0x440   :  { %v541_v33 = vadd.f32 1.0, %v1286_v32 }
 0x442   :  { %1287 = vrcp.f32 %v541_v33  ;;  %v568_v38 = vand.u32 2147483648, %v541_v33  ;;  %v566_v41 = vand.u32 2147483647, %v541_v33  ;;  %vm562_vm12 = vweird.f32 %v541_v33 }
 0x443   :  { %1289 = vpow2.f32 %v1243_v29 }
 0x444   :  { %v569_v45 = vor.u32 1.1754944e-38, %v568_v38  ;;  %vm567_vm14 = vcmp.eq.f32.partialorder %v566_v41, 8.507059e+37 }
 0x448   :  { %v1288_v34 = vpop.eup %1287 }
 0x449   :  { %v558_v35 = vmul.f32 %v1288_v34, %v541_v33  ;;  %vm563_vm11 = vweird.f32 %v1288_v34  ;;  %v1290_v32 = vpop.eup %1289 }
 0x44a   :  { %vm564_vm13 = vmor %vm562_vm12, %vm563_vm11  ;;  %v540_v33 = vadd.f32 1.0, %v1290_v32 }
 0x44b   :  { %v559_v37 = vsub.f32 1.0, %v558_v35 }
 0x44c   :  { %1291 = vrcp.f32 %v540_v33  ;;  %v553_v41 = vand.u32 2147483648, %v540_v33  ;;  %vm547_vm0 = vweird.f32 %v540_v33 }
 0x44d   :  { %v560_v39 = vmul.f32 %v1288_v34, %v559_v37 }
 0x44f   :  { %v561_v43 = vadd.f32 %v1288_v34, %v560_v39 }
 0x451   :  { %v565_v50 = vsel %vm564_vm13, %v1288_v34, %v561_v43 }
 0x452   :  { %v570_v53 = vsel %vm567_vm14, %v569_v45, %v565_v50  ;;  %v1292_v35 = vpop.eup %1291  ;;  %v551_v45 = vand.u32 2147483647, %v540_v33  ;;  %vm625_vm14 = vcmask 1046533  }
 0x453   :  { %v575_v56 = vmul.f32 %v573_v47, %v570_v53  ;;  %v543_v37 = vmul.f32 %v1292_v35, %v540_v33  ;;  %vm548_vm15 = vweird.f32 %v1292_v35 }
 0x454   :  { %vm549_vm1 = vmor %vm547_vm0, %vm548_vm15  ;;  %vm552_vm2 = vcmp.eq.f32.partialorder %v551_v45, 8.507059e+37 }
 0x455   :  { %v593_v58 = vrot.slane %v575_v56, 5  ;;  %v544_v4 = vsub.f32 1.0, %v543_v37  ;;  %v554_v56 = vor.u32 1.1754944e-38, %v553_v41 }
 0x457   :  { %611 = vmatmul.f32.vlgmr.msra.gmra.mxu2 %v593_v58  ;;  %v545_v34 = vmul.f32 %v1292_v35, %v544_v4 }
 0x459   :  { %v546_v38 = vadd.f32 %v1292_v35, %v545_v34 }
 0x45b   :  { %v550_v53 = vsel %vm549_vm1, %v1292_v35, %v546_v38 }
 0x45c   :  { %v555_v58 = vsel %vm552_vm2, %v554_v56, %v550_v53 }
 0x45d   :  { %v621_v16 = vsub.f32 1.0, %v555_v58  ;;  %v620_v26 = vmul.f32 %v573_v47, %v555_v58  ;;  %v647_v47 = vrot.slane %v1581_v51, 7 }
 0x4da   :  { %v612_v39 = vpop.f32.mrf.mxu2 }
 0x4db   :  { %v616_v43 = vrot.slane %v612_v39, 3 }
 0x4dd   :  { %v618_v50 = vadd.f32 %v616_v43, %v1575_v31 }
 0x4df   :  { %1293 = vtanh.f32 %v618_v50 }
 0x4e5   :  { %v1294_v22 = vpop.eup %1293 }
 0x4e6   :  { %v622_v29 = vmul.f32 %v1294_v22, %v621_v16 }
 0x4e8   :  { %v1809_v32 = vadd.f32 %v622_v29, %v620_v26  ;;  %v1840_v26 = vpop.f32.mrf.mxu0 }
 0x4ea   :  { %624 = vst [vmem:[#allocation2] sm:$0x60] %v1809_v32 }
 0x4f1   :  { %v636_v33 = vld [vmem:[%s635_s13] sm:$0x1] }
 0x4f2   :  { %v640_v37 = vld [vmem:[%s639_s14] sm:$0x1]  ;;  %637 = vst [vmem:[#allocation3] sm:$0x1] %v636_v33 }
 0x4f3   :  { %v644_v35 = vld [vmem:[%s643_s2] sm:$0x1]  ;;  %641 = vst [vmem:[#allocation3 + $0x1] sm:$0x1] %v640_v37 }
 0x4f4   :  { %645 = vst [vmem:[#allocation3 + $0x2] sm:$0x1] %v644_v35 }
 0x4fb   :  { %v646_v4 = vld [vmem:[#allocation3] sm:$0x7] }
 0x4fc   :  { %664 = vmatpush.xpose.msrb.mxu1 %v646_v4 }
 0x4ff   :  { %665 = vmatmul.f32.vlgmr.msrb.gmra.mxu1 %v647_v47 }
 0x500   :  { %1250 = vmatpush.msk.msra.mxu1 %vm710_vm3, %v646_v4 }
 0x502   :  { %875 = vmatpush.xpose.msrb.mxu1 %v1713_v59 }
 0x506   :  { %876 = vmatpush.xpose.msrb.mxu1 %v1717_v60 }
 0x50a   :  { %877 = vmatpush.xpose.msrb.mxu1 %v1721_v61 }
 0x50e   :  { %878 = vmatpush.xpose.msrb.mxu1 %v1725_v62 }
 0x512   :  { %879 = vmatpush.xpose.msrb.mxu1 %v1729_v63 }
 0x516   :  { %880 = vmatpush.xpose.msrb.mxu1 %v1733_v1 }
 0x51a   :  { %881 = vmatpush.xpose.msrb.mxu1 %v1737_v2 }
 0x51e   :  { %882 = vmatpush.xpose.msrb.mxu1 %v1762_v5 }
 0x522   :  { %883 = vmatpush.xpose.msrb.mxu1 %v1766_v6 }
 0x526   :  { %884 = vmatpush.xpose.msrb.mxu1 %v1770_v7 }
 0x52a   :  { %885 = vmatpush.xpose.msrb.mxu1 %v1774_v8 }
 0x52e   :  { %886 = vmatpush.xpose.msrb.mxu1 %v1778_v9  ;;  %v1249_v9 = vld [vmem:[%s1906_s9 + $0x2] sm:$0x3] }
 0x532   :  { %887 = vmatpush.xpose.msrb.mxu1 %v1782_v10 }
 0x536   :  { %888 = vmatpush.xpose.msrb.mxu1 %v1786_v11 }
 0x53a   :  { %889 = vmatpush.xpose.msrb.mxu1 %v1791_v14 }
 0x53e   :  { %890 = vmatpush.xpose.msrb.mxu1 %v1799_v25 }
 0x57c   :  { %v666_v51 = vpop.f32.mrf.mxu1 }
 0x57d   :  { %v1248_v59 = vmul.f32 -1.442695, %v666_v51 }
 0x57f   :  { %1295 = vpow2.f32 %v1248_v59 }
 0x585   :  { %v1296_v60 = vpop.eup %1295 }
 0x586   :  { %v672_v61 = vadd.f32 1.0, %v1296_v60 }
 0x588   :  { %1297 = vrcp.f32 %v672_v61  ;;  %v684_v2 = vand.u32 2147483648, %v672_v61  ;;  %v682_v6 = vand.u32 2147483647, %v672_v61  ;;  %vm678_vm5 = vweird.f32 %v672_v61 }
 0x58a   :  { %v685_v8 = vor.u32 1.1754944e-38, %v684_v2  ;;  %vm683_vm7 = vcmp.eq.f32.partialorder %v682_v6, 8.507059e+37 }
 0x58e   :  { %v1298_v62 = vpop.eup %1297 }
 0x58f   :  { %v674_v63 = vmul.f32 %v1298_v62, %v672_v61  ;;  %vm679_vm4 = vweird.f32 %v1298_v62 }
 0x590   :  { %vm680_vm6 = vmor %vm678_vm5, %vm679_vm4 }
 0x591   :  { %v675_v1 = vsub.f32 1.0, %v674_v63 }
 0x593   :  { %v676_v5 = vmul.f32 %v1298_v62, %v675_v1 }
 0x595   :  { %v677_v7 = vadd.f32 %v1298_v62, %v676_v5 }
 0x597   :  { %v681_v10 = vsel %vm680_vm6, %v1298_v62, %v677_v7 }
 0x598   :  { %v686_v11 = vsel %vm683_vm7, %v685_v8, %v681_v10 }
 0x599   :  { %v690_v14 = vadd.f32 %v1249_v9, %v686_v11 }
 0x59b   :  { %v692_v25 = vsel %vm691_vm8, %v690_v14, -inf }
 0x59c   :  { %693 = vmax.xlane.f32.xlu1 %v692_v25 }
 0x60f   :  { %v694_v34 = vpop.xlane.xlu1 %693 }
 0x610   :  { %v695_v38 = vsub.f32 %v690_v14, %v694_v34 }
 0x612   :  { %v696_v39 = vmul.f32 1.442695, %v695_v38 }
 0x614   :  { %1299 = vpow2.f32 %v696_v39  ;;  %v626_v39 = vsel %vm625_vm14, %v1809_v32, -inf }
 0x61a   :  { %v1300_v41 = vpop.eup %1299 }
 0x61b   :  { %v698_v43 = vsel %vm691_vm8, %v1300_v41, 0.0 }
 0x61c   :  { %699 = vadd.xlane.f32.xlu1 %v698_v43  ;;  %v627_v43 = vrot.slane %v626_v39, 4 }
 0x68f   :  { %v700_v45 = vpop.xlane.xlu1 %699 }
 0x690   :  { %1301 = vrcp.f32 %v700_v45 }
 0x696   :  { %v1302_v50 = vpop.eup %1301 }
 0x697   :  { %v702_v53 = vmul.f32 %v1302_v50, %v700_v45 }
 0x699   :  { %v703_v56 = vsub.f32 2.0, %v702_v53 }
 0x69b   :  { %v704_v58 = vmul.f32 %v1302_v50, %v703_v56  ;;  %v628_v50 = vmax.f32 %v626_v39, %v627_v43 }
 0x69d   :  { %v705_v16 = vmul.f32 %v1300_v41, %v704_v58  ;;  %v629_v56 = vrot.slane %v628_v50, 2 }
 0x69f   :  { %1251 = vmatmul.msk.f32.vlgmr.msra.gmra.mxu1 %vm706_vm9, %v705_v16 }
 0x71c   :  { %v1836_v22 = vpop.f32.mrf.mxu1 }
 0x71d   :  { %782 = vmatmul.f32.vlgmr.msra.gmra.mxu3 %v1836_v22  ;;  %802 = vmatmul.f32.vlgmr.msra.gmra.mxu0 %v1836_v22  ;;  %v853_v5 = vrot.slane %v1836_v22, 1 }
 0x79a   :  { %v803_v29 = vpop.f32.mrf.mxu0 }
 0x79b   :  { %v809_v33 = vrot.slane %v803_v29, 1 }
 0x79d   :  { %v813_v37 = vadd.f32 %v809_v33, %v1797_v18  ;;  %v630_v33 = vmax.f32 %v628_v50, %v629_v56 }
 0x79f   :  { %v1253_v35 = vmul.f32 -1.442695, %v813_v37  ;;  %v631_v32 = vrot.slane %v630_v33, 1 }
 0x7a0   :  { %v783_v9 = vpop.f32.mrf.mxu3 }
 0x7a1   :  { %1303 = vpow2.f32 %v1253_v35  ;;  %v808_v10 = vrot.slane %v783_v9, 1 }
 0x7a3   :  { %v812_v11 = vadd.f32 %v808_v10, %v1569_v23 }
 0x7a5   :  { %v1252_v14 = vmul.f32 -1.442695, %v812_v11 }
 0x7a7   :  { %v1304_v4 = vpop.eup %1303 }
 0x7a8   :  { %v821_v47 = vadd.f32 1.0, %v1304_v4 }
 0x7aa   :  { %1305 = vrcp.f32 %v821_v47  ;;  %v848_v61 = vand.u32 2147483648, %v821_v47  ;;  %v846_v63 = vand.u32 2147483647, %v821_v47  ;;  %vm842_vm11 = vweird.f32 %v821_v47 }
 0x7ab   :  { %1307 = vpow2.f32 %v1252_v14 }
 0x7ac   :  { %v849_v2 = vor.u32 1.1754944e-38, %v848_v61  ;;  %vm847_vm13 = vcmp.eq.f32.partialorder %v846_v63, 8.507059e+37 }
 0x7b0   :  { %v1306_v51 = vpop.eup %1305 }
 0x7b1   :  { %v838_v59 = vmul.f32 %v1306_v51, %v821_v47  ;;  %vm843_vm10 = vweird.f32 %v1306_v51  ;;  %v1308_v25 = vpop.eup %1307 }
 0x7b2   :  { %vm844_vm12 = vmor %vm842_vm11, %vm843_vm10  ;;  %v820_v34 = vadd.f32 1.0, %v1308_v25 }
 0x7b3   :  { %v839_v60 = vsub.f32 1.0, %v838_v59  ;;  %v632_v59 = vmax.f32 %v630_v33, %v631_v32 }
 0x7b4   :  { %1309 = vrcp.f32 %v820_v34  ;;  %v833_v22 = vand.u32 2147483648, %v820_v34  ;;  %vm827_vm0 = vweird.f32 %v820_v34  ;;  %v831_v29 = vand.u32 2147483647, %v820_v34 }
 0x7b5   :  { %v840_v62 = vmul.f32 %v1306_v51, %v839_v60 }
 0x7b6   :  { %v834_v4 = vor.u32 1.1754944e-38, %v833_v22  ;;  %vm832_vm2 = vcmp.eq.f32.partialorder %v831_v29, 8.507059e+37 }
 0x7b7   :  { %v841_v1 = vadd.f32 %v1306_v51, %v840_v62 }
 0x7b9   :  { %v845_v6 = vsel %vm844_vm12, %v1306_v51, %v841_v1  ;;  %v633_v1 = vmax.f32 %v632_v59, -1e+30  ;;  %v248_v59 = vadd.f32 %v1584_v54, %v219_v21  ;;  %v294_v21 = vadd.f32 %v1805_v0, %v221_v27 }
 0x7ba   :  { %v850_v18 = vsel %vm847_vm13, %v849_v2, %v845_v6  ;;  %v1310_v38 = vpop.eup %1309 }
 0x7bb   :  { %v855_v7 = vmul.f32 %v853_v5, %v850_v18  ;;  %v823_v41 = vmul.f32 %v1310_v38, %v820_v34  ;;  %vm828_vm15 = vweird.f32 %v1310_v38 }
 0x7bc   :  { %vm829_vm1 = vmor %vm827_vm0, %vm828_vm15  ;;  %vm1186_vm15 = vcmask 24576  }
 0x7bd   :  { %v873_v8 = vrot.slane %v855_v7, 7  ;;  %v824_v45 = vsub.f32 1.0, %v823_v41 }
 0x7bf   :  { %891 = vmatmul.f32.vlgmr.msrb.gmra.mxu1 %v873_v8  ;;  %v825_v53 = vmul.f32 %v1310_v38, %v824_v45  ;;  %v271_v45 = vadd.f32 %v1739_v3, %v220_v12 }
 0x7c1   :  { %v826_v58 = vadd.f32 %v1310_v38, %v825_v53 }
 0x7c3   :  { %v830_v35 = vsel %vm829_vm1, %v1310_v38, %v826_v58 }
 0x7c4   :  { %v835_v47 = vsel %vm832_vm2, %v834_v4, %v830_v35 }
 0x7c5   :  { %v901_v51 = vsub.f32 1.0, %v835_v47  ;;  %v900_v61 = vmul.f32 %v853_v5, %v835_v47  ;;  %v317_v5 = vadd.f32 %v1840_v26, %v222_v49 }
 0x83c   :  { %v892_v16 = vpop.f32.mrf.mxu1 }
 0x83d   :  { %v896_v23 = vrot.slane %v892_v16, 1 }
 0x83f   :  { %v898_v37 = vadd.f32 %v896_v23, %v1575_v31 }
 0x841   :  { %1311 = vtanh.f32 %v898_v37 }
 0x847   :  { %v1312_v60 = vpop.eup %1311 }
 0x848   :  { %v902_v62 = vmul.f32 %v1312_v60, %v901_v51 }
 0x84a   :  { %v903_v63 = vadd.f32 %v902_v62, %v900_v61 }
 0x84c   :  { %904 = vst [vmem:[#allocation2] sm:$0x80] %v903_v63  ;;  %v1847_v2 = vmax.f32 %v633_v1, %v903_v63  ;;  %v1161_v1 = vld [vmem:[%s1904_s7] sm:$0xf] }
 0x84d   :  { %1181 = vmatpush.xpose.msra.mxu1 %v1161_v1 }
 0x853   :  { %v908_v31 = vld [vmem:[%s907_s1] sm:$0x1] }
 0x854   :  { %v912_v6 = vld [vmem:[%s911_s18] sm:$0x1]  ;;  %909 = vst [vmem:[#allocation3] sm:$0x1] %v908_v31 }
 0x855   :  { %v916_v18 = vld [vmem:[%s915_s4] sm:$0x1]  ;;  %913 = vst [vmem:[#allocation3 + $0x1] sm:$0x1] %v912_v6 }
 0x856   :  { %917 = vst [vmem:[#allocation3 + $0x2] sm:$0x1] %v916_v18 }
 0x85d   :  { %v918_v7 = vld [vmem:[#allocation3] sm:$0x7] }
 0x85e   :  { %934 = vmatpush.xpose.msrb.mxu2 %v918_v7 }
 0x861   :  { %935 = vmatmul.f32.vlgmr.msrb.gmra.mxu2 %v317_v5 }
 0x862   :  { %1259 = vmatpush.msk.msra.mxu2 %vm710_vm3, %v918_v7 }
 0x864   :  { %1033 = vmatpush.xpose.msrb.mxu2 %v1589_v13 }
 0x868   :  { %1034 = vmatpush.xpose.msrb.mxu2 %v1595_v15 }
 0x86c   :  { %1035 = vmatpush.xpose.msrb.mxu2 %v1602_v17 }
 0x870   :  { %1036 = vmatpush.xpose.msrb.mxu2 %v1609_v19 }
 0x874   :  { %1037 = vmatpush.xpose.msrb.mxu2 %v1616_v24 }
 0x878   :  { %1038 = vmatpush.xpose.msrb.mxu2 %v1623_v28 }
 0x87c   :  { %1039 = vmatpush.xpose.msrb.mxu2 %v1630_v30 }
 0x880   :  { %1040 = vmatpush.xpose.msrb.mxu2 %v1637_v36 }
 0x884   :  { %1041 = vmatpush.xpose.msrb.mxu2 %v1644_v40 }
 0x888   :  { %1042 = vmatpush.xpose.msrb.mxu2 %v1651_v42 }
 0x88c   :  { %1043 = vmatpush.xpose.msrb.mxu2 %v1658_v44 }
 0x890   :  { %1044 = vmatpush.xpose.msrb.mxu2 %v1665_v46  ;;  %v1258_v46 = vld [vmem:[%s1906_s9 + $0x4] sm:$0x3] }
 0x894   :  { %1045 = vmatpush.xpose.msrb.mxu2 %v1672_v48 }
 0x898   :  { %1046 = vmatpush.xpose.msrb.mxu2 %v1679_v52 }
 0x89c   :  { %1047 = vmatpush.xpose.msrb.mxu2 %v1686_v55 }
 0x8a0   :  { %1048 = vmatpush.xpose.msrb.mxu2 %v1693_v57 }
 0x8e4   :  { %v936_v49 = vpop.f32.mrf.mxu2 }
 0x8e5   :  { %v1257_v13 = vmul.f32 -1.442695, %v936_v49 }
 0x8e7   :  { %1313 = vpow2.f32 %v1257_v13 }
 0x8ed   :  { %v1314_v15 = vpop.eup %1313 }
 0x8ee   :  { %v942_v17 = vadd.f32 1.0, %v1314_v15 }
 0x8f0   :  { %1315 = vrcp.f32 %v942_v17  ;;  %v954_v30 = vand.u32 2147483648, %v942_v17  ;;  %v952_v40 = vand.u32 2147483647, %v942_v17  ;;  %vm948_vm4 = vweird.f32 %v942_v17 }
 0x8f2   :  { %v955_v44 = vor.u32 1.1754944e-38, %v954_v30  ;;  %vm953_vm6 = vcmp.eq.f32.partialorder %v952_v40, 8.507059e+37 }
 0x8f6   :  { %v1316_v19 = vpop.eup %1315 }
 0x8f7   :  { %v944_v24 = vmul.f32 %v1316_v19, %v942_v17  ;;  %vm949_vm3 = vweird.f32 %v1316_v19 }
 0x8f8   :  { %vm950_vm5 = vmor %vm948_vm4, %vm949_vm3 }
 0x8f9   :  { %v945_v28 = vsub.f32 1.0, %v944_v24 }
 0x8fb   :  { %v946_v36 = vmul.f32 %v1316_v19, %v945_v28 }
 0x8fd   :  { %v947_v42 = vadd.f32 %v1316_v19, %v946_v36 }
 0x8ff   :  { %v951_v48 = vsel %vm950_vm5, %v1316_v19, %v947_v42 }
 0x900   :  { %v956_v52 = vsel %vm953_vm6, %v955_v44, %v951_v48  ;;  %v1162_v44 = vld [vmem:[%s1905_s8] sm:$0x1]  ;;  %s1484_s8 = smov [#allocation14]  }
 0x901   :  { %v960_v55 = vadd.f32 %v1258_v46, %v956_v52  ;;  %s1207_s23 = sshll.u32 %s1484_s8, 4  ;;  %s1208_s23 = int_to_ptr.vmem [resolvable:$true] %s1207_s23 }
 0x903   :  { %v961_v57 = vsel %vm691_vm8, %v960_v55, -inf }
 0x904   :  { %962 = vmax.xlane.f32.xlu2 %v961_v57 }
 0x977   :  { %v963_v26 = vpop.xlane.xlu2 %962 }
 0x978   :  { %v964_v8 = vsub.f32 %v960_v55, %v963_v26 }
 0x97a   :  { %v965_v9 = vmul.f32 1.442695, %v964_v8 }
 0x97c   :  { %1317 = vpow2.f32 %v965_v9 }
 0x982   :  { %v1318_v10 = vpop.eup %1317 }
 0x983   :  { %v967_v11 = vsel %vm691_vm8, %v1318_v10, 0.0 }
 0x984   :  { %968 = vadd.xlane.f32.xlu2 %v967_v11 }
 0x9f7   :  { %v969_v14 = vpop.xlane.xlu2 %968 }
 0x9f8   :  { %1319 = vrcp.f32 %v969_v14 }
 0x9fe   :  { %v1320_v25 = vpop.eup %1319 }
 0x9ff   :  { %v971_v34 = vmul.f32 %v1320_v25, %v969_v14 }
 0xa01   :  { %v972_v38 = vsub.f32 2.0, %v971_v34 }
 0xa03   :  { %v973_v39 = vmul.f32 %v1320_v25, %v972_v38 }
 0xa05   :  { %v974_v41 = vmul.f32 %v1318_v10, %v973_v39 }
 0xa07   :  { %1260 = vmatmul.msk.f32.vlgmr.msra.gmra.mxu2 %vm706_vm9, %v974_v41 }
 0xa8a   :  { %v998_v43 = vpop.f32.mrf.mxu2 }
 0xa8b   :  { %1049 = vmatmul.f32.vlgmr.msrb.gmra.mxu2 %v998_v43  ;;  %1069 = vmatmul.f32.vlgmr.msrb.gmra.mxu3 %v998_v43 }
 0xb0e   :  { %v1070_v50 = vpop.f32.mrf.mxu3  ;;  %v1050_v51 = vpop.f32.mrf.mxu2 }
 0xb0f   :  { %v1074_v53 = vadd.f32 %v1070_v50, %v271_v45  ;;  %v1073_v60 = vadd.f32 %v1050_v51, %v248_v59 }
 0xb11   :  { %v1262_v56 = vmul.f32 -1.442695, %v1074_v53  ;;  %v1261_v61 = vmul.f32 -1.442695, %v1073_v60 }
 0xb13   :  { %1321 = vpow2.f32 %v1262_v56 }
 0xb19   :  { %v1322_v58 = vpop.eup %1321 }
 0xb1a   :  { %v1082_v16 = vadd.f32 1.0, %v1322_v58 }
 0xb1c   :  { %1323 = vrcp.f32 %v1082_v16  ;;  %v1109_v33 = vand.u32 2147483648, %v1082_v16  ;;  %v1107_v35 = vand.u32 2147483647, %v1082_v16  ;;  %vm1103_vm8 = vweird.f32 %v1082_v16 }
 0xb1d   :  { %1325 = vpow2.f32 %v1261_v61 }
 0xb1e   :  { %v1110_v32 = vor.u32 1.1754944e-38, %v1109_v33  ;;  %vm1108_vm10 = vcmp.eq.f32.partialorder %v1107_v35, 8.507059e+37 }
 0xb22   :  { %v1324_v22 = vpop.eup %1323 }
 0xb23   :  { %v1099_v23 = vmul.f32 %v1324_v22, %v1082_v16  ;;  %vm1104_vm7 = vweird.f32 %v1324_v22  ;;  %v1326_v62 = vpop.eup %1325 }
 0xb24   :  { %vm1105_vm9 = vmor %vm1103_vm8, %vm1104_vm7  ;;  %v1081_v63 = vadd.f32 1.0, %v1326_v62 }
 0xb25   :  { %v1100_v29 = vsub.f32 1.0, %v1099_v23 }
 0xb26   :  { %1327 = vrcp.f32 %v1081_v63  ;;  %v1094_v54 = vand.u32 2147483648, %v1081_v63  ;;  %vm1088_vm12 = vweird.f32 %v1081_v63  ;;  %v1092_v49 = vand.u32 2147483647, %v1081_v63 }
 0xb27   :  { %v1101_v37 = vmul.f32 %v1324_v22, %v1100_v29 }
 0xb28   :  { %v1095_v19 = vor.u32 1.1754944e-38, %v1094_v54  ;;  %vm1093_vm14 = vcmp.eq.f32.partialorder %v1092_v49, 8.507059e+37 }
 0xb29   :  { %v1102_v4 = vadd.f32 %v1324_v22, %v1101_v37 }
 0xb2b   :  { %v1106_v47 = vsel %vm1105_vm9, %v1324_v22, %v1102_v4 }
 0xb2c   :  { %v1111_v3 = vsel %vm1108_vm10, %v1110_v32, %v1106_v47  ;;  %v1328_v31 = vpop.eup %1327 }
 0xb2d   :  { %v1113_v12 = vmul.f32 %v1111_v3, %v998_v43  ;;  %v1084_v6 = vmul.f32 %v1328_v31, %v1081_v63  ;;  %vm1089_vm11 = vweird.f32 %v1328_v31 }
 0xb2e   :  { %vm1090_vm13 = vmor %vm1088_vm12, %vm1089_vm11 }
 0xb2f   :  { %1146 = vmatmul.f32.vlgmr.msrb.gmra.mxu0 %v1113_v12  ;;  %v1085_v18 = vsub.f32 1.0, %v1084_v6 }
 0xb31   :  { %v1086_v7 = vmul.f32 %v1328_v31, %v1085_v18 }
 0xb33   :  { %v1087_v5 = vadd.f32 %v1328_v31, %v1086_v7 }
 0xb35   :  { %v1091_v17 = vsel %vm1090_vm13, %v1328_v31, %v1087_v5 }
 0xb36   :  { %v1096_v24 = vsel %vm1093_vm14, %v1095_v19, %v1091_v17 }
 0xb37   :  { %v1153_v28 = vsub.f32 1.0, %v1096_v24  ;;  %v1152_v36 = vmul.f32 %v1096_v24, %v998_v43 }
 0xbac   :  { %v1147_v13 = vpop.f32.mrf.mxu0 }
 0xbad   :  { %v1150_v15 = vadd.f32 %v1147_v13, %v294_v21 }
 0xbaf   :  { %1329 = vtanh.f32 %v1150_v15 }
 0xbb5   :  { %v1330_v30 = vpop.eup %1329 }
 0xbb6   :  { %v1154_v40 = vmul.f32 %v1330_v30, %v1153_v28 }
 0xbb8   :  { %v1155_v42 = vadd.f32 %v1154_v40, %v1152_v36 }
 0xbba   :  { %1156 = vst [vmem:[#allocation2 + $0x8] sm:$0x1] %v1155_v42  ;;  %v1158_v20 = vrot.slane %v1155_v42, 1 }
 0xbbc   :  { %v1160_v27 = vmax.f32 %v1847_v2, %v1158_v20 }
 0xbbe   :  { %v1164_v0 = vrot.slane %v1160_v27, 7 }
 0xbc0   :  { %1182 = vmatmul.f32.vlgmr.msra.gmra.mxu1 %v1164_v0 }
 0xc3d   :  { %v1183_v46 = vpop.f32.mrf.mxu1 }
 0xc3e   :  { %v1184_v48 = vadd.f32 %v1183_v46, %v1162_v44 }
 0xc40   :  { %v1187_v52 = vsel %vm1186_vm15, %v1184_v48, -inf }
 0xc41   :  { %1188 = vmax.xlane.f32.xlu0 %v1187_v52 }
 0xcb4   :  { %v1189_v55 = vpop.xlane.xlu0 %1188 }
 0xcb5   :  { %v1190_v57 = vsub.f32 %v1184_v48, %v1189_v55 }
 0xcb7   :  { %v1191_v26 = vmul.f32 1.442695, %v1190_v57 }
 0xcb9   :  { %1331 = vpow2.f32 %v1191_v26 }
 0xcbf   :  { %v1332_v8 = vpop.eup %1331 }
 0xcc0   :  { %v1193_v9 = vsel %vm1186_vm15, %v1332_v8, 0.0 }
 0xcc1   :  { %1194 = vadd.xlane.f32.xlu1 %v1193_v9 }
 0xd34   :  { %v1195_v2 = vpop.xlane.xlu1 %1194 }
 0xd35   :  { %1333 = vrcp.f32 %v1195_v2 }
 0xd3b   :  { %v1334_v10 = vpop.eup %1333 }
 0xd3c   :  { %v1197_v11 = vmul.f32 %v1334_v10, %v1195_v2 }
 0xd3e   :  { %v1198_v14 = vsub.f32 2.0, %v1197_v11 }
 0xd40   :  { %v1199_v25 = vmul.f32 %v1334_v10, %v1198_v14 }
 0xd42   :  { %v1200_v34 = vmul.f32 %v1332_v8, %v1199_v25 }
 0xd44   :  { %1201 = vst.msk [vmem:[#allocation14] sm:$0x1] %vm1186_vm15, %v1200_v34 }
 0xd45   :  { %1212 = dma.vmem_to_hbm [thread:$0]  %s1208_s23, 16, %s1210_s26, [#allocation6]  }
 0xd46   :  { %1475 = dma.done.wait [#allocation6], 16  }
 0xd47   :  { %1476 = vsyncadd [#allocation6], 4294967280 }
 0xd48   :  { %1217 = vsyncpa [#allocation5], 1 }
 0xd49   :  { %1218 = vsyncpa [#allocation10], 1 }
 0xd4a   :  { %1219 = vsyncpa [#allocation13], 1 }
 0xd4b   :  { %1220 = vsyncpa [#allocation6], 1 }
 0xd4c   :  { %1221 = vsyncpa [#allocation7], 1 }

</bundles_post_ra>
